<compile_context>
chip_gen: v7x
topology: tpu7x:2x2x1
jax: 0.10.0
libtpu: 0.0.40
codegen_flags: <defaults>
</compile_context>

<pallas_src>
import functools

import jax
import jax.numpy as jnp
from jax.experimental import pallas as pl
from jax.experimental.pallas import tpu as pltpu

BN_EPS = 1e-5


# ----------------------------------- kernel -----------------------------------
def _fpn_kernel(x_ref, wb_ref, b_ref, g_ref, beta_ref, rm_ref, rv_ref, fold_ref,
                o_ref, pad_ref, *, n, h, w, c, use_batch_stats, eps):
    wc = w * c
    nh = n * h
    inv_count = 1.0 / float(n * h * w)

    # Zero ONLY the top/bottom border rows of the padded scratch, once.
    zero_row = jnp.zeros((n, 1, wc), jnp.float32)
    pad_ref[:, 0:1, :] = zero_row
    pad_ref[:, h + 1:h + 2, :] = zero_row

    def prow(ref, layer):                       # (1, wc) lane-dense param row
        return ref[layer:layer + 1, :]

    fold = fold_ref[...]                        # (wc, wc) channel-selector

    def conv_relu_bn(xd, layer):
        # xd: (nh, wc) lane-dense activations; row = n*H + y, lane = x*C + ch.
        # ---- Conv2d(3x3, pad=1) as ONE banded matmul (K = 3*W*C) ----
        pad_ref[:, 1:h + 1, :] = xd.reshape(n, h, wc)
        patches = jnp.concatenate(
            [pad_ref[:, dh:dh + h, :].reshape(nh, wc) for dh in range(3)],
            axis=1)                                               # (nh, 3*wc)
        acc = jnp.dot(patches, wb_ref[layer],
                      preferred_element_type=jnp.float32)         # (nh, wc)
        # ---- bias + ReLU (full 128-lane occupancy) ----
        y = jnp.maximum(acc + prow(b_ref, layer), 0.0)
        # ---- BatchNorm2d ----
        if use_batch_stats:
            # training-mode forward: per-channel batch stats over (N, H, W).
            # dot with the channel-selector folds the W groups and broadcasts
            # the per-channel result back across all 128 lanes (MXU is idle).
            mu = jnp.sum(jnp.dot(y, fold, preferred_element_type=jnp.float32),
                         axis=0, keepdims=True) * inv_count
            d = y - mu
            var = jnp.sum(jnp.dot(d * d, fold,
                                  preferred_element_type=jnp.float32),
                          axis=0, keepdims=True) * inv_count
        else:
            # eval-mode forward: running statistics
            d = y - prow(rm_ref, layer)
            var = prow(rv_ref, layer)
        # TODO(synk): running-stats EMA update (training-time side effect of
        # nn.BatchNorm2d) is intentionally omitted from this functional forward.
        inv = jax.lax.rsqrt(var + eps)                            # EUP rsqrt
        return d * (inv * prow(g_ref, layer)) + prow(beta_ref, layer)

    x0 = x_ref[...]                       # (nh, wc)
    x1 = conv_relu_bn(x0, 0)              # downsample1
    x2 = conv_relu_bn(x1, 1)              # downsample2
    xu2 = conv_relu_bn(x2, 2)             # upsample2
    xu1 = conv_relu_bn(xu2 + x1, 3)       # upsample1 (skip connection)
    o_ref[...] = xu1                      # unmasked lane-dense store


# ----------------------------------- wrapper -----------------------------------
def _banded_weights(wgt, width):
    """(L,3,3,C,C) HWIO -> (L, 3*width*C, width*C) banded conv matrices.

    band[l][dh*width*C + w_in*C + ci, w_out*C + co] = wgt[l, dh, dw, ci, co]
    with w_in = w_out + dw - 1; out-of-range taps simply have no entry, which
    implements the width zero-padding."""
    L = wgt.shape[0]
    C = wgt.shape[-1]
    bands = []
    for layer in range(L):
        per_dh = []
        for dh in range(3):
            m = jnp.zeros((width * C, width * C), wgt.dtype)
            for dw in range(3):
                m = m + jnp.kron(jnp.eye(width, k=1 - dw, dtype=wgt.dtype),
                                 wgt[layer, dh, dw])
            per_dh.append(m)
        bands.append(jnp.concatenate(per_dh, axis=0))     # (3*width*C, width*C)
    return jnp.stack(bands)                               # (L, 3*width*C, width*C)


def fpn_forward(x_nchw, params, *, use_batch_stats=True):
    n, c, h, w = x_nchw.shape
    wc = w * c
    nh = n * h
    # Lane-dense input: NHWC flattened to (N*H, W*C); W*C = 128 at demo size.
    x_dense = jnp.transpose(x_nchw, (0, 2, 3, 1)).astype(jnp.float32).reshape(nh, wc)
    wb = _banded_weights(params["w"].astype(jnp.float32), w)        # (4, 3*wc, wc)
    tile = lambda p: jnp.tile(p.astype(jnp.float32), (1, w))        # (4, wc)
    fold = jnp.kron(jnp.ones((w, w), jnp.float32), jnp.eye(c, dtype=jnp.float32))

    kernel = functools.partial(_fpn_kernel, n=n, h=h, w=w, c=c,
                               use_batch_stats=use_batch_stats, eps=BN_EPS)
    out = pl.pallas_call(
        kernel,
        grid=(1,),
        in_specs=[
            pl.BlockSpec((nh, wc), lambda i: (0, 0)),             # x (lane-dense)
            pl.BlockSpec((4, 3 * wc, wc), lambda i: (0, 0, 0)),   # banded conv weights
            pl.BlockSpec((4, wc), lambda i: (0, 0)),              # conv bias (tiled)
            pl.BlockSpec((4, wc), lambda i: (0, 0)),              # BN gamma (tiled)
            pl.BlockSpec((4, wc), lambda i: (0, 0)),              # BN beta (tiled)
            pl.BlockSpec((4, wc), lambda i: (0, 0)),              # BN running_mean
            pl.BlockSpec((4, wc), lambda i: (0, 0)),              # BN running_var
            pl.BlockSpec((wc, wc), lambda i: (0, 0)),             # channel fold matrix
        ],
        out_specs=pl.BlockSpec((nh, wc), lambda i: (0, 0)),
        out_shape=jax.ShapeDtypeStruct((nh, wc), jnp.float32),
        scratch_shapes=[pltpu.VMEM((n, h + 2, wc), jnp.float32)],  # padded rows
        compiler_params=pltpu.CompilerParams(dimension_semantics=("arbitrary",)),
    )(x_dense, wb, tile(params["b"]), tile(params["gamma"]), tile(params["beta"]),
      tile(params["rm"]), tile(params["rv"]), fold)
    return jnp.transpose(out.reshape(n, h, w, c), (0, 3, 1, 2))


# ------------------------------ params / reference ------------------------------
def make_params(key, c):
    ks = jax.random.split(key, 2)
    w = 0.15 * jax.random.normal(ks[0], (4, 3, 3, c, c), dtype=jnp.float32)  # HWIO
    b = 0.05 * jax.random.normal(ks[1], (4, c), dtype=jnp.float32)
    return {
        "w": w, "b": b,
        "gamma": jnp.ones((4, c), jnp.float32),   # BatchNorm2d default init
        "beta": jnp.zeros((4, c), jnp.float32),
        "rm": jnp.zeros((4, c), jnp.float32),     # running_mean default
        "rv": jnp.ones((4, c), jnp.float32),      # running_var default
    }


def ref_forward(x_nchw, params, use_batch_stats=True, eps=BN_EPS):
    x = jnp.transpose(x_nchw, (0, 2, 3, 1)).astype(jnp.float32)   # NHWC

    def block(xin, layer):
        y = jax.lax.conv_general_dilated(
            xin, params["w"][layer], window_strides=(1, 1), padding="SAME",
            dimension_numbers=("NHWC", "HWIO", "NHWC")) + params["b"][layer]
        y = jnp.maximum(y, 0.0)
        if use_batch_stats:
            mu = y.mean(axis=(0, 1, 2), keepdims=True)
            var = ((y - mu) ** 2).mean(axis=(0, 1, 2), keepdims=True)
        else:
            mu = params["rm"][layer].reshape(1, 1, 1, -1)
            var = params["rv"][layer].reshape(1, 1, 1, -1)
        return ((y - mu) * jax.lax.rsqrt(var + eps) * params["gamma"][layer]
                + params["beta"][layer])

    x1 = block(x, 0)
    x2 = block(x1, 1)
    xu2 = block(x2, 2)
    xu1 = block(xu2 + x1, 3)
    return jnp.transpose(xu1, (0, 3, 1, 2))


# -------------------------------------- main --------------------------------------
if __name__ == "__main__":
    # The module's forward requires in_channels == out_channels (x_up2 + x1).
    # C=8, W=16 makes the lane-dense row width W*C exactly 128.
    N, C, H, W = 2, 8, 16, 16

    keys = jax.random.split(jax.random.PRNGKey(0), 2)
    params = make_params(keys[0], C)
    x = (0.5 * jax.random.normal(keys[1], (N, C, H, W))).astype(jnp.float32)

    forward = jax.jit(lambda xx, pp: fpn_forward(xx, pp))
    out = forward(x, params)
    out = jax.block_until_ready(out)

    ref = ref_forward(x, params)
    err = float(jnp.max(jnp.abs(out - ref)))
    assert out.shape == (N, C, H, W), out.shape
    assert err < 1e-3, f"max abs err vs reference: {err}"
    print("KERNEL_OK")
</pallas_src>

<mosaic_0001>
module attributes {stable_mosaic.version = 11 : i64} {
  func.func @_fpn_kernel(%arg0: i32, %arg1: memref<32x128xf32, #tpu.memory_space<vmem>>, %arg2: memref<4x384x128xf32, #tpu.memory_space<vmem>>, %arg3: memref<4x128xf32, #tpu.memory_space<vmem>>, %arg4: memref<4x128xf32, #tpu.memory_space<vmem>>, %arg5: memref<4x128xf32, #tpu.memory_space<vmem>>, %arg6: memref<4x128xf32, #tpu.memory_space<vmem>>, %arg7: memref<4x128xf32, #tpu.memory_space<vmem>>, %arg8: memref<128x128xf32, #tpu.memory_space<vmem>>, %arg9: memref<32x128xf32, #tpu.memory_space<vmem>>, %arg10: memref<2x18x128xf32, #tpu.memory_space<vmem>>) attributes {dimension_semantics = [#tpu.dimension_semantics<arbitrary>], iteration_bounds = array<i64: 1>, scalar_prefetch = 0 : i64, scratch_operands = 1 : i64, tpu.core_type = #tpu.core_type<tc>, window_params = [{pipeline_mode = #tpu.pipeline_mode<synchronous>, transform_indices = @transform_0, window_bounds = array<i64: 32, 128>}, {pipeline_mode = #tpu.pipeline_mode<synchronous>, transform_indices = @transform_1, window_bounds = array<i64: 4, 384, 128>}, {pipeline_mode = #tpu.pipeline_mode<synchronous>, transform_indices = @transform_2, window_bounds = array<i64: 4, 128>}, {pipeline_mode = #tpu.pipeline_mode<synchronous>, transform_indices = @transform_3, window_bounds = array<i64: 4, 128>}, {pipeline_mode = #tpu.pipeline_mode<synchronous>, transform_indices = @transform_4, window_bounds = array<i64: 4, 128>}, {pipeline_mode = #tpu.pipeline_mode<synchronous>, transform_indices = @transform_5, window_bounds = array<i64: 4, 128>}, {pipeline_mode = #tpu.pipeline_mode<synchronous>, transform_indices = @transform_6, window_bounds = array<i64: 4, 128>}, {pipeline_mode = #tpu.pipeline_mode<synchronous>, transform_indices = @transform_7, window_bounds = array<i64: 128, 128>}, {pipeline_mode = #tpu.pipeline_mode<synchronous>, transform_indices = @transform_8, window_bounds = array<i64: 32, 128>}]} {
    %cst = arith.constant 0.000000e+00 : f32
    %0 = vector.broadcast %cst : f32 to vector<2x1x128xf32>
    %c0 = arith.constant 0 : index
    %c0_0 = arith.constant 0 : index
    %c0_1 = arith.constant 0 : index
    %1 = vector.load %arg10[%c0, %c0_0, %c0_1] : memref<2x18x128xf32, #tpu.memory_space<vmem>>, vector<2x1x128xf32>
    tpu.vector_store %arg10[%c0, %c0_0, %c0_1], %0 {strides = array<i32>} : memref<2x18x128xf32, #tpu.memory_space<vmem>>, vector<2x1x128xf32>,
    %c0_2 = arith.constant 0 : index
    %c17 = arith.constant 17 : index
    %c0_3 = arith.constant 0 : index
    %2 = vector.load %arg10[%c0_2, %c17, %c0_3] : memref<2x18x128xf32, #tpu.memory_space<vmem>>, vector<2x1x128xf32>
    tpu.vector_store %arg10[%c0_2, %c17, %c0_3], %0 {strides = array<i32>} : memref<2x18x128xf32, #tpu.memory_space<vmem>>, vector<2x1x128xf32>,
    %c0_4 = arith.constant 0 : index
    %c0_5 = arith.constant 0 : index
    %3 = vector.load %arg8[%c0_4, %c0_5] : memref<128x128xf32, #tpu.memory_space<vmem>>, vector<128x128xf32>
    %c0_6 = arith.constant 0 : index
    %c0_7 = arith.constant 0 : index
    %4 = vector.load %arg1[%c0_6, %c0_7] : memref<32x128xf32, #tpu.memory_space<vmem>>, vector<32x128xf32>
    %5 = vector.shape_cast %4 : vector<32x128xf32> to vector<2x16x128xf32>
    %c0_8 = arith.constant 0 : index
    %c1 = arith.constant 1 : index
    %c0_9 = arith.constant 0 : index
    %6 = vector.load %arg10[%c0_8, %c1, %c0_9] : memref<2x18x128xf32, #tpu.memory_space<vmem>>, vector<2x16x128xf32>
    tpu.vector_store %arg10[%c0_8, %c1, %c0_9], %5 {strides = array<i32>} : memref<2x18x128xf32, #tpu.memory_space<vmem>>, vector<2x16x128xf32>,
    %c0_10 = arith.constant 0 : index
    %c0_11 = arith.constant 0 : index
    %c0_12 = arith.constant 0 : index
    %7 = vector.load %arg10[%c0_10, %c0_11, %c0_12] : memref<2x18x128xf32, #tpu.memory_space<vmem>>, vector<2x16x128xf32>
    %8 = vector.shape_cast %7 : vector<2x16x128xf32> to vector<32x128xf32>
    %c0_13 = arith.constant 0 : index
    %c1_14 = arith.constant 1 : index
    %c0_15 = arith.constant 0 : index
    %9 = vector.load %arg10[%c0_13, %c1_14, %c0_15] : memref<2x18x128xf32, #tpu.memory_space<vmem>>, vector<2x16x128xf32>
    %10 = vector.shape_cast %9 : vector<2x16x128xf32> to vector<32x128xf32>
    %c0_16 = arith.constant 0 : index
    %c2 = arith.constant 2 : index
    %c0_17 = arith.constant 0 : index
    %11 = vector.load %arg10[%c0_16, %c2, %c0_17] : memref<2x18x128xf32, #tpu.memory_space<vmem>>, vector<2x16x128xf32>
    %12 = vector.shape_cast %11 : vector<2x16x128xf32> to vector<32x128xf32>
    %13 = tpu.concatenate %8, %10, %12 in 1 : vector<32x128xf32>, vector<32x128xf32>, vector<32x128xf32> -> vector<32x384xf32>
    %c0_18 = arith.constant 0 : index
    %c0_19 = arith.constant 0 : index
    %c0_20 = arith.constant 0 : index
    %14 = vector.load %arg2[%c0_18, %c0_19, %c0_20] : memref<4x384x128xf32, #tpu.memory_space<vmem>>, vector<1x384x128xf32>
    %15 = vector.shape_cast %14 : vector<1x384x128xf32> to vector<384x128xf32>
    %cst_21 = arith.constant dense<0.000000e+00> : vector<32x128xf32>
    %16 = tpu.matmul %13, %15, %cst_21 {dimension_numbers = #tpu.dot_dimension_numbers<[1], [0], [0], [1], [0, 0, 1, 1], [], []>} : vector<32x384xf32>, vector<384x128xf32>, vector<32x128xf32> -> vector<32x128xf32>
    %c0_22 = arith.constant 0 : index
    %c0_23 = arith.constant 0 : index
    %17 = vector.load %arg3[%c0_22, %c0_23] : memref<4x128xf32, #tpu.memory_space<vmem>>, vector<1x128xf32>
    %18 = vector.broadcast %17 : vector<1x128xf32> to vector<32x128xf32>
    %19 = arith.addf %16, %18 : vector<32x128xf32>
    %cst_24 = arith.constant 0.000000e+00 : f32
    %20 = vector.broadcast %cst_24 : f32 to vector<32x128xf32>
    %21 = arith.maximumf %19, %20 : vector<32x128xf32>
    %cst_25 = arith.constant dense<0.000000e+00> : vector<32x128xf32>
    %22 = tpu.matmul %21, %3, %cst_25 {dimension_numbers = #tpu.dot_dimension_numbers<[1], [0], [0], [1], [0, 0, 1, 1], [], []>} : vector<32x128xf32>, vector<128x128xf32>, vector<32x128xf32> -> vector<32x128xf32>
    %cst_26 = arith.constant dense<0.000000e+00> : vector<128xf32>
    %23 = vector.multi_reduction <add>, %22, %cst_26 [0] : vector<32x128xf32> to vector<128xf32>
    %24 = vector.shape_cast %23 : vector<128xf32> to vector<1x128xf32>
    %cst_27 = arith.constant 0.001953125 : f32
    %25 = vector.broadcast %cst_27 : f32 to vector<1x128xf32>
    %26 = arith.mulf %24, %25 : vector<1x128xf32>
    %27 = vector.broadcast %26 : vector<1x128xf32> to vector<32x128xf32>
    %28 = arith.subf %21, %27 : vector<32x128xf32>
    %29 = arith.mulf %28, %28 : vector<32x128xf32>
    %cst_28 = arith.constant dense<0.000000e+00> : vector<32x128xf32>
    %30 = tpu.matmul %29, %3, %cst_28 {dimension_numbers = #tpu.dot_dimension_numbers<[1], [0], [0], [1], [0, 0, 1, 1], [], []>} : vector<32x128xf32>, vector<128x128xf32>, vector<32x128xf32> -> vector<32x128xf32>
    %cst_29 = arith.constant dense<0.000000e+00> : vector<128xf32>
    %31 = vector.multi_reduction <add>, %30, %cst_29 [0] : vector<32x128xf32> to vector<128xf32>
    %32 = vector.shape_cast %31 : vector<128xf32> to vector<1x128xf32>
    %cst_30 = arith.constant 0.001953125 : f32
    %33 = vector.broadcast %cst_30 : f32 to vector<1x128xf32>
    %34 = arith.mulf %32, %33 : vector<1x128xf32>
    %cst_31 = arith.constant 9.99999974E-6 : f32
    %35 = vector.broadcast %cst_31 : f32 to vector<1x128xf32>
    %36 = arith.addf %34, %35 : vector<1x128xf32>
    %37 = math.rsqrt %36 : vector<1x128xf32>
    %c0_32 = arith.constant 0 : index
    %c0_33 = arith.constant 0 : index
    %38 = vector.load %arg4[%c0_32, %c0_33] : memref<4x128xf32, #tpu.memory_space<vmem>>, vector<1x128xf32>
    %39 = arith.mulf %37, %38 : vector<1x128xf32>
    %40 = vector.broadcast %39 : vector<1x128xf32> to vector<32x128xf32>
    %41 = arith.mulf %28, %40 : vector<32x128xf32>
    %c0_34 = arith.constant 0 : index
    %c0_35 = arith.constant 0 : index
    %42 = vector.load %arg5[%c0_34, %c0_35] : memref<4x128xf32, #tpu.memory_space<vmem>>, vector<1x128xf32>
    %43 = vector.broadcast %42 : vector<1x128xf32> to vector<32x128xf32>
    %44 = arith.addf %41, %43 : vector<32x128xf32>
    %45 = vector.shape_cast %44 : vector<32x128xf32> to vector<2x16x128xf32>
    %c0_36 = arith.constant 0 : index
    %c1_37 = arith.constant 1 : index
    %c0_38 = arith.constant 0 : index
    %46 = vector.load %arg10[%c0_36, %c1_37, %c0_38] : memref<2x18x128xf32, #tpu.memory_space<vmem>>, vector<2x16x128xf32>
    tpu.vector_store %arg10[%c0_36, %c1_37, %c0_38], %45 {strides = array<i32>} : memref<2x18x128xf32, #tpu.memory_space<vmem>>, vector<2x16x128xf32>,
    %c0_39 = arith.constant 0 : index
    %c0_40 = arith.constant 0 : index
    %c0_41 = arith.constant 0 : index
    %47 = vector.load %arg10[%c0_39, %c0_40, %c0_41] : memref<2x18x128xf32, #tpu.memory_space<vmem>>, vector<2x16x128xf32>
    %48 = vector.shape_cast %47 : vector<2x16x128xf32> to vector<32x128xf32>
    %c0_42 = arith.constant 0 : index
    %c1_43 = arith.constant 1 : index
    %c0_44 = arith.constant 0 : index
    %49 = vector.load %arg10[%c0_42, %c1_43, %c0_44] : memref<2x18x128xf32, #tpu.memory_space<vmem>>, vector<2x16x128xf32>
    %50 = vector.shape_cast %49 : vector<2x16x128xf32> to vector<32x128xf32>
    %c0_45 = arith.constant 0 : index
    %c2_46 = arith.constant 2 : index
    %c0_47 = arith.constant 0 : index
    %51 = vector.load %arg10[%c0_45, %c2_46, %c0_47] : memref<2x18x128xf32, #tpu.memory_space<vmem>>, vector<2x16x128xf32>
    %52 = vector.shape_cast %51 : vector<2x16x128xf32> to vector<32x128xf32>
    %53 = tpu.concatenate %48, %50, %52 in 1 : vector<32x128xf32>, vector<32x128xf32>, vector<32x128xf32> -> vector<32x384xf32>
    %c1_48 = arith.constant 1 : index
    %c0_49 = arith.constant 0 : index
    %c0_50 = arith.constant 0 : index
    %54 = vector.load %arg2[%c1_48, %c0_49, %c0_50] : memref<4x384x128xf32, #tpu.memory_space<vmem>>, vector<1x384x128xf32>
    %55 = vector.shape_cast %54 : vector<1x384x128xf32> to vector<384x128xf32>
    %cst_51 = arith.constant dense<0.000000e+00> : vector<32x128xf32>
    %56 = tpu.matmul %53, %55, %cst_51 {dimension_numbers = #tpu.dot_dimension_numbers<[1], [0], [0], [1], [0, 0, 1, 1], [], []>} : vector<32x384xf32>, vector<384x128xf32>, vector<32x128xf32> -> vector<32x128xf32>
    %c1_52 = arith.constant 1 : index
    %c0_53 = arith.constant 0 : index
    %57 = vector.load %arg3[%c1_52, %c0_53] : memref<4x128xf32, #tpu.memory_space<vmem>>, vector<1x128xf32>
    %58 = vector.broadcast %57 : vector<1x128xf32> to vector<32x128xf32>
    %59 = arith.addf %56, %58 : vector<32x128xf32>
    %cst_54 = arith.constant 0.000000e+00 : f32
    %60 = vector.broadcast %cst_54 : f32 to vector<32x128xf32>
    %61 = arith.maximumf %59, %60 : vector<32x128xf32>
    %cst_55 = arith.constant dense<0.000000e+00> : vector<32x128xf32>
    %62 = tpu.matmul %61, %3, %cst_55 {dimension_numbers = #tpu.dot_dimension_numbers<[1], [0], [0], [1], [0, 0, 1, 1], [], []>} : vector<32x128xf32>, vector<128x128xf32>, vector<32x128xf32> -> vector<32x128xf32>
    %cst_56 = arith.constant dense<0.000000e+00> : vector<128xf32>
    %63 = vector.multi_reduction <add>, %62, %cst_56 [0] : vector<32x128xf32> to vector<128xf32>
    %64 = vector.shape_cast %63 : vector<128xf32> to vector<1x128xf32>
    %cst_57 = arith.constant 0.001953125 : f32
    %65 = vector.broadcast %cst_57 : f32 to vector<1x128xf32>
    %66 = arith.mulf %64, %65 : vector<1x128xf32>
    %67 = vector.broadcast %66 : vector<1x128xf32> to vector<32x128xf32>
    %68 = arith.subf %61, %67 : vector<32x128xf32>
    %69 = arith.mulf %68, %68 : vector<32x128xf32>
    %cst_58 = arith.constant dense<0.000000e+00> : vector<32x128xf32>
    %70 = tpu.matmul %69, %3, %cst_58 {dimension_numbers = #tpu.dot_dimension_numbers<[1], [0], [0], [1], [0, 0, 1, 1], [], []>} : vector<32x128xf32>, vector<128x128xf32>, vector<32x128xf32> -> vector<32x128xf32>
    %cst_59 = arith.constant dense<0.000000e+00> : vector<128xf32>
    %71 = vector.multi_reduction <add>, %70, %cst_59 [0] : vector<32x128xf32> to vector<128xf32>
    %72 = vector.shape_cast %71 : vector<128xf32> to vector<1x128xf32>
    %cst_60 = arith.constant 0.001953125 : f32
    %73 = vector.broadcast %cst_60 : f32 to vector<1x128xf32>
    %74 = arith.mulf %72, %73 : vector<1x128xf32>
    %cst_61 = arith.constant 9.99999974E-6 : f32
    %75 = vector.broadcast %cst_61 : f32 to vector<1x128xf32>
    %76 = arith.addf %74, %75 : vector<1x128xf32>
    %77 = math.rsqrt %76 : vector<1x128xf32>
    %c1_62 = arith.constant 1 : index
    %c0_63 = arith.constant 0 : index
    %78 = vector.load %arg4[%c1_62, %c0_63] : memref<4x128xf32, #tpu.memory_space<vmem>>, vector<1x128xf32>
    %79 = arith.mulf %77, %78 : vector<1x128xf32>
    %80 = vector.broadcast %79 : vector<1x128xf32> to vector<32x128xf32>
    %81 = arith.mulf %68, %80 : vector<32x128xf32>
    %c1_64 = arith.constant 1 : index
    %c0_65 = arith.constant 0 : index
    %82 = vector.load %arg5[%c1_64, %c0_65] : memref<4x128xf32, #tpu.memory_space<vmem>>, vector<1x128xf32>
    %83 = vector.broadcast %82 : vector<1x128xf32> to vector<32x128xf32>
    %84 = arith.addf %81, %83 : vector<32x128xf32>
    %85 = vector.shape_cast %84 : vector<32x128xf32> to vector<2x16x128xf32>
    %c0_66 = arith.constant 0 : index
    %c1_67 = arith.constant 1 : index
    %c0_68 = arith.constant 0 : index
    %86 = vector.load %arg10[%c0_66, %c1_67, %c0_68] : memref<2x18x128xf32, #tpu.memory_space<vmem>>, vector<2x16x128xf32>
    tpu.vector_store %arg10[%c0_66, %c1_67, %c0_68], %85 {strides = array<i32>} : memref<2x18x128xf32, #tpu.memory_space<vmem>>, vector<2x16x128xf32>,
    %c0_69 = arith.constant 0 : index
    %c0_70 = arith.constant 0 : index
    %c0_71 = arith.constant 0 : index
    %87 = vector.load %arg10[%c0_69, %c0_70, %c0_71] : memref<2x18x128xf32, #tpu.memory_space<vmem>>, vector<2x16x128xf32>
    %88 = vector.shape_cast %87 : vector<2x16x128xf32> to vector<32x128xf32>
    %c0_72 = arith.constant 0 : index
    %c1_73 = arith.constant 1 : index
    %c0_74 = arith.constant 0 : index
    %89 = vector.load %arg10[%c0_72, %c1_73, %c0_74] : memref<2x18x128xf32, #tpu.memory_space<vmem>>, vector<2x16x128xf32>
    %90 = vector.shape_cast %89 : vector<2x16x128xf32> to vector<32x128xf32>
    %c0_75 = arith.constant 0 : index
    %c2_76 = arith.constant 2 : index
    %c0_77 = arith.constant 0 : index
    %91 = vector.load %arg10[%c0_75, %c2_76, %c0_77] : memref<2x18x128xf32, #tpu.memory_space<vmem>>, vector<2x16x128xf32>
    %92 = vector.shape_cast %91 : vector<2x16x128xf32> to vector<32x128xf32>
    %93 = tpu.concatenate %88, %90, %92 in 1 : vector<32x128xf32>, vector<32x128xf32>, vector<32x128xf32> -> vector<32x384xf32>
    %c2_78 = arith.constant 2 : index
    %c0_79 = arith.constant 0 : index
    %c0_80 = arith.constant 0 : index
    %94 = vector.load %arg2[%c2_78, %c0_79, %c0_80] : memref<4x384x128xf32, #tpu.memory_space<vmem>>, vector<1x384x128xf32>
    %95 = vector.shape_cast %94 : vector<1x384x128xf32> to vector<384x128xf32>
    %cst_81 = arith.constant dense<0.000000e+00> : vector<32x128xf32>
    %96 = tpu.matmul %93, %95, %cst_81 {dimension_numbers = #tpu.dot_dimension_numbers<[1], [0], [0], [1], [0, 0, 1, 1], [], []>} : vector<32x384xf32>, vector<384x128xf32>, vector<32x128xf32> -> vector<32x128xf32>
    %c2_82 = arith.constant 2 : index
    %c0_83 = arith.constant 0 : index
    %97 = vector.load %arg3[%c2_82, %c0_83] : memref<4x128xf32, #tpu.memory_space<vmem>>, vector<1x128xf32>
    %98 = vector.broadcast %97 : vector<1x128xf32> to vector<32x128xf32>
    %99 = arith.addf %96, %98 : vector<32x128xf32>
    %cst_84 = arith.constant 0.000000e+00 : f32
    %100 = vector.broadcast %cst_84 : f32 to vector<32x128xf32>
    %101 = arith.maximumf %99, %100 : vector<32x128xf32>
    %cst_85 = arith.constant dense<0.000000e+00> : vector<32x128xf32>
    %102 = tpu.matmul %101, %3, %cst_85 {dimension_numbers = #tpu.dot_dimension_numbers<[1], [0], [0], [1], [0, 0, 1, 1], [], []>} : vector<32x128xf32>, vector<128x128xf32>, vector<32x128xf32> -> vector<32x128xf32>
    %cst_86 = arith.constant dense<0.000000e+00> : vector<128xf32>
    %103 = vector.multi_reduction <add>, %102, %cst_86 [0] : vector<32x128xf32> to vector<128xf32>
    %104 = vector.shape_cast %103 : vector<128xf32> to vector<1x128xf32>
    %cst_87 = arith.constant 0.001953125 : f32
    %105 = vector.broadcast %cst_87 : f32 to vector<1x128xf32>
    %106 = arith.mulf %104, %105 : vector<1x128xf32>
    %107 = vector.broadcast %106 : vector<1x128xf32> to vector<32x128xf32>
    %108 = arith.subf %101, %107 : vector<32x128xf32>
    %109 = arith.mulf %108, %108 : vector<32x128xf32>
    %cst_88 = arith.constant dense<0.000000e+00> : vector<32x128xf32>
    %110 = tpu.matmul %109, %3, %cst_88 {dimension_numbers = #tpu.dot_dimension_numbers<[1], [0], [0], [1], [0, 0, 1, 1], [], []>} : vector<32x128xf32>, vector<128x128xf32>, vector<32x128xf32> -> vector<32x128xf32>
    %cst_89 = arith.constant dense<0.000000e+00> : vector<128xf32>
    %111 = vector.multi_reduction <add>, %110, %cst_89 [0] : vector<32x128xf32> to vector<128xf32>
    %112 = vector.shape_cast %111 : vector<128xf32> to vector<1x128xf32>
    %cst_90 = arith.constant 0.001953125 : f32
    %113 = vector.broadcast %cst_90 : f32 to vector<1x128xf32>
    %114 = arith.mulf %112, %113 : vector<1x128xf32>
    %cst_91 = arith.constant 9.99999974E-6 : f32
    %115 = vector.broadcast %cst_91 : f32 to vector<1x128xf32>
    %116 = arith.addf %114, %115 : vector<1x128xf32>
    %117 = math.rsqrt %116 : vector<1x128xf32>
    %c2_92 = arith.constant 2 : index
    %c0_93 = arith.constant 0 : index
    %118 = vector.load %arg4[%c2_92, %c0_93] : memref<4x128xf32, #tpu.memory_space<vmem>>, vector<1x128xf32>
    %119 = arith.mulf %117, %118 : vector<1x128xf32>
    %120 = vector.broadcast %119 : vector<1x128xf32> to vector<32x128xf32>
    %121 = arith.mulf %108, %120 : vector<32x128xf32>
    %c2_94 = arith.constant 2 : index
    %c0_95 = arith.constant 0 : index
    %122 = vector.load %arg5[%c2_94, %c0_95] : memref<4x128xf32, #tpu.memory_space<vmem>>, vector<1x128xf32>
    %123 = vector.broadcast %122 : vector<1x128xf32> to vector<32x128xf32>
    %124 = arith.addf %121, %123 : vector<32x128xf32>
    %125 = arith.addf %124, %44 : vector<32x128xf32>
    %126 = vector.shape_cast %125 : vector<32x128xf32> to vector<2x16x128xf32>
    %c0_96 = arith.constant 0 : index
    %c1_97 = arith.constant 1 : index
    %c0_98 = arith.constant 0 : index
    %127 = vector.load %arg10[%c0_96, %c1_97, %c0_98] : memref<2x18x128xf32, #tpu.memory_space<vmem>>, vector<2x16x128xf32>
    tpu.vector_store %arg10[%c0_96, %c1_97, %c0_98], %126 {strides = array<i32>} : memref<2x18x128xf32, #tpu.memory_space<vmem>>, vector<2x16x128xf32>,
    %c0_99 = arith.constant 0 : index
    %c0_100 = arith.constant 0 : index
    %c0_101 = arith.constant 0 : index
    %128 = vector.load %arg10[%c0_99, %c0_100, %c0_101] : memref<2x18x128xf32, #tpu.memory_space<vmem>>, vector<2x16x128xf32>
    %129 = vector.shape_cast %128 : vector<2x16x128xf32> to vector<32x128xf32>
    %c0_102 = arith.constant 0 : index
    %c1_103 = arith.constant 1 : index
    %c0_104 = arith.constant 0 : index
    %130 = vector.load %arg10[%c0_102, %c1_103, %c0_104] : memref<2x18x128xf32, #tpu.memory_space<vmem>>, vector<2x16x128xf32>
    %131 = vector.shape_cast %130 : vector<2x16x128xf32> to vector<32x128xf32>
    %c0_105 = arith.constant 0 : index
    %c2_106 = arith.constant 2 : index
    %c0_107 = arith.constant 0 : index
    %132 = vector.load %arg10[%c0_105, %c2_106, %c0_107] : memref<2x18x128xf32, #tpu.memory_space<vmem>>, vector<2x16x128xf32>
    %133 = vector.shape_cast %132 : vector<2x16x128xf32> to vector<32x128xf32>
    %134 = tpu.concatenate %129, %131, %133 in 1 : vector<32x128xf32>, vector<32x128xf32>, vector<32x128xf32> -> vector<32x384xf32>
    %c3 = arith.constant 3 : index
    %c0_108 = arith.constant 0 : index
    %c0_109 = arith.constant 0 : index
    %135 = vector.load %arg2[%c3, %c0_108, %c0_109] : memref<4x384x128xf32, #tpu.memory_space<vmem>>, vector<1x384x128xf32>
    %136 = vector.shape_cast %135 : vector<1x384x128xf32> to vector<384x128xf32>
    %cst_110 = arith.constant dense<0.000000e+00> : vector<32x128xf32>
    %137 = tpu.matmul %134, %136, %cst_110 {dimension_numbers = #tpu.dot_dimension_numbers<[1], [0], [0], [1], [0, 0, 1, 1], [], []>} : vector<32x384xf32>, vector<384x128xf32>, vector<32x128xf32> -> vector<32x128xf32>
    %c3_111 = arith.constant 3 : index
    %c0_112 = arith.constant 0 : index
    %138 = vector.load %arg3[%c3_111, %c0_112] : memref<4x128xf32, #tpu.memory_space<vmem>>, vector<1x128xf32>
    %139 = vector.broadcast %138 : vector<1x128xf32> to vector<32x128xf32>
    %140 = arith.addf %137, %139 : vector<32x128xf32>
    %cst_113 = arith.constant 0.000000e+00 : f32
    %141 = vector.broadcast %cst_113 : f32 to vector<32x128xf32>
    %142 = arith.maximumf %140, %141 : vector<32x128xf32>
    %cst_114 = arith.constant dense<0.000000e+00> : vector<32x128xf32>
    %143 = tpu.matmul %142, %3, %cst_114 {dimension_numbers = #tpu.dot_dimension_numbers<[1], [0], [0], [1], [0, 0, 1, 1], [], []>} : vector<32x128xf32>, vector<128x128xf32>, vector<32x128xf32> -> vector<32x128xf32>
    %cst_115 = arith.constant dense<0.000000e+00> : vector<128xf32>
    %144 = vector.multi_reduction <add>, %143, %cst_115 [0] : vector<32x128xf32> to vector<128xf32>
    %145 = vector.shape_cast %144 : vector<128xf32> to vector<1x128xf32>
    %cst_116 = arith.constant 0.001953125 : f32
    %146 = vector.broadcast %cst_116 : f32 to vector<1x128xf32>
    %147 = arith.mulf %145, %146 : vector<1x128xf32>
    %148 = vector.broadcast %147 : vector<1x128xf32> to vector<32x128xf32>
    %149 = arith.subf %142, %148 : vector<32x128xf32>
    %150 = arith.mulf %149, %149 : vector<32x128xf32>
    %cst_117 = arith.constant dense<0.000000e+00> : vector<32x128xf32>
    %151 = tpu.matmul %150, %3, %cst_117 {dimension_numbers = #tpu.dot_dimension_numbers<[1], [0], [0], [1], [0, 0, 1, 1], [], []>} : vector<32x128xf32>, vector<128x128xf32>, vector<32x128xf32> -> vector<32x128xf32>
    %cst_118 = arith.constant dense<0.000000e+00> : vector<128xf32>
    %152 = vector.multi_reduction <add>, %151, %cst_118 [0] : vector<32x128xf32> to vector<128xf32>
    %153 = vector.shape_cast %152 : vector<128xf32> to vector<1x128xf32>
    %cst_119 = arith.constant 0.001953125 : f32
    %154 = vector.broadcast %cst_119 : f32 to vector<1x128xf32>
    %155 = arith.mulf %153, %154 : vector<1x128xf32>
    %cst_120 = arith.constant 9.99999974E-6 : f32
    %156 = vector.broadcast %cst_120 : f32 to vector<1x128xf32>
    %157 = arith.addf %155, %156 : vector<1x128xf32>
    %158 = math.rsqrt %157 : vector<1x128xf32>
    %c3_121 = arith.constant 3 : index
    %c0_122 = arith.constant 0 : index
    %159 = vector.load %arg4[%c3_121, %c0_122] : memref<4x128xf32, #tpu.memory_space<vmem>>, vector<1x128xf32>
    %160 = arith.mulf %158, %159 : vector<1x128xf32>
    %161 = vector.broadcast %160 : vector<1x128xf32> to vector<32x128xf32>
    %162 = arith.mulf %149, %161 : vector<32x128xf32>
    %c3_123 = arith.constant 3 : index
    %c0_124 = arith.constant 0 : index
    %163 = vector.load %arg5[%c3_123, %c0_124] : memref<4x128xf32, #tpu.memory_space<vmem>>, vector<1x128xf32>
    %164 = vector.broadcast %163 : vector<1x128xf32> to vector<32x128xf32>
    %165 = arith.addf %162, %164 : vector<32x128xf32>
    %c0_125 = arith.constant 0 : index
    %c0_126 = arith.constant 0 : index
    %166 = vector.load %arg9[%c0_125, %c0_126] : memref<32x128xf32, #tpu.memory_space<vmem>>, vector<32x128xf32>
    tpu.vector_store %arg9[%c0_125, %c0_126], %165 {strides = array<i32>} : memref<32x128xf32, #tpu.memory_space<vmem>>, vector<32x128xf32>,
    return
  }
  func.func @transform_0(%arg0: i32) -> (i32, i32) {
    %c0_i32 = arith.constant 0 : i32
    %c0_i32_0 = arith.constant 0 : i32
    %c0_i32_1 = arith.constant 0 : i32
    return %c0_i32, %c0_i32_0 : i32, i32
  }
  func.func @transform_1(%arg0: i32) -> (i32, i32, i32) {
    %c0_i32 = arith.constant 0 : i32
    %c0_i32_0 = arith.constant 0 : i32
    %c0_i32_1 = arith.constant 0 : i32
    %c0_i32_2 = arith.constant 0 : i32
    return %c0_i32, %c0_i32_0, %c0_i32_1 : i32, i32, i32
  }
  func.func @transform_2(%arg0: i32) -> (i32, i32) {
    %c0_i32 = arith.constant 0 : i32
    %c0_i32_0 = arith.constant 0 : i32
    %c0_i32_1 = arith.constant 0 : i32
    return %c0_i32, %c0_i32_0 : i32, i32
  }
  func.func @transform_3(%arg0: i32) -> (i32, i32) {
    %c0_i32 = arith.constant 0 : i32
    %c0_i32_0 = arith.constant 0 : i32
    %c0_i32_1 = arith.constant 0 : i32
    return %c0_i32, %c0_i32_0 : i32, i32
  }
  func.func @transform_4(%arg0: i32) -> (i32, i32) {
    %c0_i32 = arith.constant 0 : i32
    %c0_i32_0 = arith.constant 0 : i32
    %c0_i32_1 = arith.constant 0 : i32
    return %c0_i32, %c0_i32_0 : i32, i32
  }
  func.func @transform_5(%arg0: i32) -> (i32, i32) {
    %c0_i32 = arith.constant 0 : i32
    %c0_i32_0 = arith.constant 0 : i32
    %c0_i32_1 = arith.constant 0 : i32
    return %c0_i32, %c0_i32_0 : i32, i32
  }
  func.func @transform_6(%arg0: i32) -> (i32, i32) {
    %c0_i32 = arith.constant 0 : i32
    %c0_i32_0 = arith.constant 0 : i32
    %c0_i32_1 = arith.constant 0 : i32
    return %c0_i32, %c0_i32_0 : i32, i32
  }
  func.func @transform_7(%arg0: i32) -> (i32, i32) {
    %c0_i32 = arith.constant 0 : i32
    %c0_i32_0 = arith.constant 0 : i32
    %c0_i32_1 = arith.constant 0 : i32
    return %c0_i32, %c0_i32_0 : i32, i32
  }
  func.func @transform_8(%arg0: i32) -> (i32, i32) {
    %c0_i32 = arith.constant 0 : i32
    %c0_i32_0 = arith.constant 0 : i32
    %c0_i32_1 = arith.constant 0 : i32
    return %c0_i32, %c0_i32_0 : i32, i32
  }
}

</mosaic_0001>

<bundles_post_ra>
// kernel: tile.29
= control target key start
LH: loop header
LB: loop body
LE: loop exit
PB: predicated region body
PF: predicated region fallthrough
CT: control target
= control target key end

     0   :  { %vm6_vm0 = vcmask 1043458   ;;  %s11_s6 = smov 3  ;;  %s14_s7 = smov 12  ;;  %vm8_vm1 = vcmask 64512   ;;  %vm20_vm2 = vcmask 1048512   ;;  %vm32_vm3 = vcmask 982912   ;;  %s381_s0 = inlined_call_operand.vmem [shape: f32[4,16,8], index: 0, kind: input, shape index: {}]   ;;  %s382_s1 = inlined_call_operand.vmem [shape: f32[4,128], index: 1, kind: output, shape index: {}]  }
   0x1   :  { %v196_v0 = vld [vmem:[%s381_s0 + $0xf] ss:$16 sm:%s11_s6]   ;;  %s35_s12 = smov 3  ;;  %s38_s15 = smov 12  ;;  %vm44_vm4 = vcmask 917312   ;;  %vm56_vm5 = vcmask 851712  }
   0x2   :  { %v197_v1 = vld [vmem:[%s381_s0 + $0xf] ss:$16 sm:%s14_s7]   ;;  %v200_v3 = vld [vmem:[%s381_s0 + $0xd] ss:$16 sm:%s35_s12]   ;;  %s241_s16 = smov 120   ;;  %s23_s19 = smov 3 }
   0x3   :  { %v17_v2 = vsel %vm6_vm0, %v197_v1, %v196_v0  ;;  %v201_v4 = vld [vmem:[%s381_s0 + $0xd] ss:$16 sm:%s38_s15]   ;;  %s26_s20 = smov 12  ;;  %v198_v6 = vld [vmem:[%s381_s0 + $0xe] ss:$16 sm:%s23_s19]   ;;  %s47_s25 = smov 3 }
   0x4   :  { %18 = vrot.lane.b32.xlu0 %v17_v2, %s241_s16  ;;  %v41_v5 = vsel %vm6_vm0, %v201_v4, %v200_v3  ;;  %v199_v7 = vld [vmem:[%s381_s0 + $0xe] ss:$16 sm:%s26_s20]   ;;  %s242_s26 = smov 104   ;;  %s50_s29 = smov 12  ;;  %vm68_vm6 = vcmask 786112   ;;  %vm80_vm7 = vcmask 720512  }
   0x5   :  { %42 = vrot.lane.b32.xlu1 %v41_v5, %s242_s26  ;;  %v29_v8 = vsel %vm6_vm0, %v199_v7, %v198_v6  ;;  %v202_v9 = vld [vmem:[%s381_s0 + $0xc] ss:$16 sm:%s47_s25]   ;;  %s59_s3 = smov 3  ;;  %s62_s4 = smov 12  ;;  %vm92_vm8 = vcmask 654912   ;;  %vm104_vm9 = vcmask 589312  }
   0x6   :  { %v203_v10 = vld [vmem:[%s381_s0 + $0xc] ss:$16 sm:%s50_s29]   ;;  %s243_s5 = smov 112   ;;  %v204_v12 = vld [vmem:[%s381_s0 + $0xb] ss:$16 sm:%s59_s3]   ;;  %s71_s8 = smov 3 }
   0x7   :  { %v53_v11 = vsel %vm6_vm0, %v203_v10, %v202_v9  ;;  %v205_v13 = vld [vmem:[%s381_s0 + $0xb] ss:$16 sm:%s62_s4]   ;;  %v206_v14 = vld [vmem:[%s381_s0 + $0xa] ss:$16 sm:%s71_s8]   ;;  %s74_s13 = smov 12  ;;  %s244_s14 = smov 96  }
   0x8   :  { %30 = vrot.lane.b32.xlu0 %v29_v8, %s243_s5  ;;  %v65_v15 = vsel %vm6_vm0, %v205_v13, %v204_v12  ;;  %v207_v16 = vld [vmem:[%s381_s0 + $0xa] ss:$16 sm:%s74_s13]   ;;  %s83_s17 = smov 3  ;;  %s86_s18 = smov 12  ;;  %vm116_vm10 = vcmask 523712   ;;  %vm128_vm11 = vcmask 458112  }
   0x9   :  { %54 = vrot.lane.b32.xlu1 %v53_v11, %s244_s14  ;;  %v77_v17 = vsel %vm6_vm0, %v207_v16, %v206_v14  ;;  %v208_v18 = vld [vmem:[%s381_s0 + $0x9] ss:$16 sm:%s83_s17]   ;;  %s95_s23 = smov 3  ;;  %s245_s24 = smov 88   ;;  %vm140_vm12 = vcmask 392512   ;;  %vm152_vm13 = vcmask 326912  }
   0xa   :  { %v209_v19 = vld [vmem:[%s381_s0 + $0x9] ss:$16 sm:%s86_s18]   ;;  %v210_v20 = vld [vmem:[%s381_s0 + $0x8] ss:$16 sm:%s95_s23]   ;;  %s98_s27 = smov 12  ;;  %s107_s30 = smov 3 }
   0xb   :  { %v89_v21 = vsel %vm6_vm0, %v209_v19, %v208_v18  ;;  %v211_v22 = vld [vmem:[%s381_s0 + $0x8] ss:$16 sm:%s98_s27]   ;;  %s110_s2 = smov 12  ;;  %s246_s3 = smov 80   ;;  %v212_v23 = vld [vmem:[%s381_s0 + $0x7] ss:$16 sm:%s107_s30]  }
   0xc   :  { %66 = vrot.lane.b32.xlu0 %v65_v15, %s245_s24  ;;  %s119_s6 = smov 3  ;;  %v101_v24 = vsel %vm6_vm0, %v211_v22, %v210_v20  ;;  %v213_v25 = vld [vmem:[%s381_s0 + $0x7] ss:$16 sm:%s110_s2]   ;;  %s122_s11 = smov 12  ;;  %vm164_vm14 = vcmask 261312   ;;  %vm176_vm15 = vcmask 195712  }
   0xd   :  { %78 = vrot.lane.b32.xlu1 %v77_v17, %s246_s3  ;;  %v214_v26 = vld [vmem:[%s381_s0 + $0x6] ss:$16 sm:%s119_s6]   ;;  %s247_s12 = smov 72   ;;  %s131_s15 = smov 3  ;;  %v113_v28 = vsel %vm6_vm0, %v213_v25, %v212_v23 }
   0xe   :  { %v215_v27 = vld [vmem:[%s381_s0 + $0x6] ss:$16 sm:%s122_s11]   ;;  %s134_s16 = smov 12  ;;  %v216_v29 = vld [vmem:[%s381_s0 + $0x5] ss:$16 sm:%s131_s15]   ;;  %s143_s19 = smov 3 }
   0xf   :  { %s248_s20 = smov 64   ;;  %v217_v30 = vld [vmem:[%s381_s0 + $0x5] ss:$16 sm:%s134_s16]   ;;  %s146_s23 = smov 12  ;;  %v125_v31 = vsel %vm6_vm0, %v215_v27, %v214_v26  ;;  %v218_v32 = vld [vmem:[%s381_s0 + $0x4] ss:$16 sm:%s143_s19]  }
  0x10   :  { %90 = vrot.lane.b32.xlu0 %v89_v21, %s247_s12  ;;  %s155_s26 = smov 3  ;;  %s158_s27 = smov 12  ;;  %v219_v33 = vld [vmem:[%s381_s0 + $0x4] ss:$16 sm:%s146_s23]   ;;  %v137_v34 = vsel %vm6_vm0, %v217_v30, %v216_v29 }
  0x11   :  { %102 = vrot.lane.b32.xlu1 %v101_v24, %s248_s20  ;;  %s249_s28 = smov 56   ;;  %s167_s2 = smov 3  ;;  %v220_v35 = vld [vmem:[%s381_s0 + $0x3] ss:$16 sm:%s155_s26]   ;;  %v149_v37 = vsel %vm6_vm0, %v219_v33, %v218_v32 }
  0x12   :  { %s170_s5 = smov 12  ;;  %s250_s6 = smov 48   ;;  %v221_v36 = vld [vmem:[%s381_s0 + $0x3] ss:$16 sm:%s158_s27]   ;;  %v222_v38 = vld [vmem:[%s381_s0 + $0x2] ss:$16 sm:%s167_s2]  }
  0x13   :  { %s179_s9 = smov 3  ;;  %v223_v39 = vld [vmem:[%s381_s0 + $0x2] ss:$16 sm:%s170_s5]   ;;  %s182_s14 = smov 12  ;;  %v161_v41 = vsel %vm6_vm0, %v221_v36, %v220_v35 }
  0x14   :  { %114 = vrot.lane.b32.xlu0 %v113_v28, %s249_s28  ;;  %s2_s15 = smov 3  ;;  %s251_s16 = smov 40   ;;  %v224_v42 = vld [vmem:[%s381_s0 + $0x1] ss:$16 sm:%s179_s9]   ;;  %v173_v46 = vsel %vm6_vm0, %v223_v39, %v222_v38 }
  0x15   :  { %126 = vrot.lane.b32.xlu1 %v125_v31, %s250_s6  ;;  %v3_v40 = vld [vmem:[%s381_s0] ss:$16 sm:%s2_s15]   ;;  %s4_s19 = smov 12  ;;  %s252_s24 = smov 32  }
  0x16   :  { %v5_v43 = vld [vmem:[%s381_s0] ss:$16 sm:%s4_s19]   ;;  %v225_v44 = vld [vmem:[%s381_s0 + $0x1] ss:$16 sm:%s182_s14]   ;;  %s253_s0 = smov 24   ;;  %s254_s27 = smov 16  }
  0x17   :  { %v7_v45 = vsel %vm6_vm0, %v5_v43, %v3_v40  ;;  %v185_v47 = vsel %vm6_vm0, %v225_v44, %v224_v42  ;;  %s255_s28 = smov 8   ;;  %vm188_vm0 = vcmask 130112  }
  0x18   :  { %138 = vrot.lane.b32.xlu0 %v137_v34, %s251_s16  ;;  %9 = vst.msk [vmem:[#allocation0] sm:$0xf] %vm8_vm1, %v7_v45  }
  0x19   :  { %150 = vrot.lane.b32.xlu1 %v149_v37, %s252_s24 }
  0x1c   :  { %162 = vrot.lane.b32.xlu0 %v161_v41, %s253_s0 }
  0x1d   :  { %174 = vrot.lane.b32.xlu1 %v173_v46, %s254_s27 }
  0x20   :  { %186 = vrot.lane.b32.xlu0 %v185_v47, %s255_s28 }
  0x76   :  { %v19_v48 = vpop.permute.xlu0 %18  }
  0x77   :  { %21 = vst.msk [vmem:[#allocation0] sm:$0xf] %vm20_vm2, %v19_v48   ;;  %v43_v49 = vpop.permute.xlu1 %42  }
  0x7a   :  { %v31_v50 = vpop.permute.xlu0 %30  }
  0x7b   :  { %33 = vst.msk [vmem:[#allocation0] sm:$0xf] %vm32_vm3, %v31_v50   ;;  %v55_v51 = vpop.permute.xlu1 %54  }
  0x7c   :  { %45 = vst.msk [vmem:[#allocation0] sm:$0xf] %vm44_vm4, %v43_v49  }
  0x7d   :  { %57 = vst.msk [vmem:[#allocation0] sm:$0xf] %vm56_vm5, %v55_v51  }
  0x7e   :  { %v67_v52 = vpop.permute.xlu0 %66  }
  0x7f   :  { %69 = vst.msk [vmem:[#allocation0] sm:$0xf] %vm68_vm6, %v67_v52   ;;  %v79_v53 = vpop.permute.xlu1 %78  }
  0x80   :  { %81 = vst.msk [vmem:[#allocation0] sm:$0xf] %vm80_vm7, %v79_v53  }
  0x82   :  { %v91_v54 = vpop.permute.xlu0 %90  }
  0x83   :  { %93 = vst.msk [vmem:[#allocation0] sm:$0xf] %vm92_vm8, %v91_v54   ;;  %v103_v55 = vpop.permute.xlu1 %102  }
  0x84   :  { %105 = vst.msk [vmem:[#allocation0] sm:$0xf] %vm104_vm9, %v103_v55  }
  0x86   :  { %v115_v56 = vpop.permute.xlu0 %114  }
  0x87   :  { %117 = vst.msk [vmem:[#allocation0] sm:$0xf] %vm116_vm10, %v115_v56   ;;  %v127_v57 = vpop.permute.xlu1 %126  }
  0x88   :  { %129 = vst.msk [vmem:[#allocation0] sm:$0xf] %vm128_vm11, %v127_v57  }
  0x8a   :  { %v139_v58 = vpop.permute.xlu0 %138  }
  0x8b   :  { %141 = vst.msk [vmem:[#allocation0] sm:$0xf] %vm140_vm12, %v139_v58   ;;  %v151_v59 = vpop.permute.xlu1 %150  }
  0x8c   :  { %153 = vst.msk [vmem:[#allocation0] sm:$0xf] %vm152_vm13, %v151_v59  }
  0x8e   :  { %v163_v60 = vpop.permute.xlu0 %162  }
  0x8f   :  { %165 = vst.msk [vmem:[#allocation0] sm:$0xf] %vm164_vm14, %v163_v60   ;;  %v175_v61 = vpop.permute.xlu1 %174  }
  0x90   :  { %177 = vst.msk [vmem:[#allocation0] sm:$0xf] %vm176_vm15, %v175_v61  }
  0x92   :  { %v187_v62 = vpop.permute.xlu0 %186  }
  0x93   :  { %189 = vst.msk [vmem:[#allocation0] sm:$0xf] %vm188_vm0, %v187_v62  }
  0x9a   :  { %v193_v63 = vld [vmem:[#allocation0] sm:$0xf] }
  0x9b   :  { %195 = vst [vmem:[%s382_s1] sm:$0xf] %v193_v63 }

// kernel: _lambda_.1
= control target key start
LH: loop header
LB: loop body
LE: loop exit
PB: predicated region body
PF: predicated region fallthrough
CT: control target
= control target key end

     0   :  { %v3461_v3 = vmov 0.0   ;;  %s4429_s1 = inlined_call_operand.vmem [shape: f32[4,384,128], index: 1, kind: input, shape index: {}]   ;;  %s4430_s5 = inlined_call_operand.vmem [shape: f32[4,128], index: 5, kind: input, shape index: {}]   ;;  %s4431_s6 = inlined_call_operand.vmem [shape: f32[4,128], index: 6, kind: input, shape index: {}]   ;;  %s4432_s0 = inlined_call_operand.vmem [shape: f32[32,128], index: 0, kind: input, shape index: {}]   ;;  %s4433_s7 = inlined_call_operand.vmem [shape: f32[128,128], index: 7, kind: input, shape index: {}]   ;;  %s4434_s2 = inlined_call_operand.vmem [shape: f32[4,128], index: 2, kind: input, shape index: {}]   ;;  %s4435_s3 = inlined_call_operand.vmem [shape: f32[4,128], index: 3, kind: input, shape index: {}]   ;;  %s4436_s4 = inlined_call_operand.vmem [shape: f32[4,128], index: 4, kind: input, shape index: {}]   ;;  %s4437_s8 = inlined_call_operand.vmem [shape: f32[32,128], index: 8, kind: output, shape index: {}]  }
   0x1   :  { %v85_v0 = vld [vmem:[%s4429_s1 + $0x80] sm:$0xff]  ;;  %v86_v1 = vld [vmem:[%s4429_s1 + $0x88] sm:$0xff]  ;;  %29 = vst [vmem:[#allocation2] sm:$0x1] %v3461_v3  ;;  %30 = vst [vmem:[#allocation2 + $0x18] sm:$0x1] %v3461_v3 }
   0x2   :  { %v69_v2 = vld [vmem:[%s4429_s1] sm:$0xff]  ;;  %31 = vst [vmem:[#allocation2 + $0x11] sm:$0x1] %v3461_v3  ;;  %32 = vst [vmem:[#allocation2 + $0x29] sm:$0x1] %v3461_v3  ;;  %v2940_v4 = vpack.c.bf16 %v86_v1, %v85_v0  ;;  %v70_v5 = vld [vmem:[%s4429_s1 + $0x8] sm:$0xff] }
   0x3   :  { %v87_v6 = vld [vmem:[%s4429_s1 + $0x90] sm:$0xff]  ;;  %v88_v7 = vld [vmem:[%s4429_s1 + $0x98] sm:$0xff]  ;;  %v2942_v8 = vpack.c.bf16 %v70_v5, %v69_v2  ;;  %v101_v10 = vld [vmem:[%s4429_s1 + $0x100] sm:$0xff] }
   0x4   :  { %v2944_v9 = vpack.c.bf16 %v88_v7, %v87_v6  ;;  %v102_v11 = vld [vmem:[%s4429_s1 + $0x108] sm:$0xff]  ;;  %v71_v12 = vld [vmem:[%s4429_s1 + $0x10] sm:$0xff]  ;;  %2941 = vmatprep.subr.bf16.mxu0 %v2940_v4  ;;  %v72_v14 = vld [vmem:[%s4429_s1 + $0x18] sm:$0xff] }
   0x5   :  { %v2972_v13 = vpack.c.bf16 %v102_v11, %v101_v10  ;;  %v89_v15 = vld [vmem:[%s4429_s1 + $0xa0] sm:$0xff]  ;;  %v90_v16 = vld [vmem:[%s4429_s1 + $0xa8] sm:$0xff]  ;;  %2943 = vmatpush3.bf16.msra.mxu0 %v2942_v8  ;;  %v2946_v17 = vpack.c.bf16 %v72_v14, %v71_v12  ;;  %v103_v18 = vld [vmem:[%s4429_s1 + $0x110] sm:$0xff] }
   0x6   :  { %v104_v19 = vld [vmem:[%s4429_s1 + $0x118] sm:$0xff]  ;;  %2945 = vmatprep.subr.bf16.mxu0 %v2944_v9  ;;  %v2948_v20 = vpack.c.bf16 %v90_v16, %v89_v15  ;;  %v73_v22 = vld [vmem:[%s4429_s1 + $0x20] sm:$0xff]  ;;  %v74_v23 = vld [vmem:[%s4429_s1 + $0x28] sm:$0xff] }
   0x7   :  { %2973 = vmatprep.subr.bf16.mxu1 %v2972_v13  ;;  %v2976_v21 = vpack.c.bf16 %v104_v19, %v103_v18  ;;  %v91_v24 = vld [vmem:[%s4429_s1 + $0xb0] sm:$0xff]  ;;  %v92_v25 = vld [vmem:[%s4429_s1 + $0xb8] sm:$0xff]  ;;  %v105_v26 = vld [vmem:[%s4429_s1 + $0x120] sm:$0xff]  ;;  %v2950_v29 = vpack.c.bf16 %v74_v23, %v73_v22 }
   0x8   :  { %2975 = vmatpush3.bf16.msra.mxu1 %v2972_v13  ;;  %v106_v27 = vld [vmem:[%s4429_s1 + $0x128] sm:$0xff]  ;;  %v107_v30 = vld [vmem:[%s4429_s1 + $0x130] sm:$0xff]  ;;  %v108_v31 = vld [vmem:[%s4429_s1 + $0x138] sm:$0xff]  ;;  %v2952_v32 = vpack.c.bf16 %v92_v25, %v91_v24 }
   0x9   :  { %2977 = vmatprep.subr.bf16.mxu1 %v2976_v21  ;;  %v2980_v28 = vpack.c.bf16 %v106_v27, %v105_v26  ;;  %2947 = vmatpush3.bf16.msra.mxu0 %v2946_v17  ;;  %v75_v33 = vld [vmem:[%s4429_s1 + $0x30] sm:$0xff]  ;;  %v76_v34 = vld [vmem:[%s4429_s1 + $0x38] sm:$0xff]  ;;  %v93_v35 = vld [vmem:[%s4429_s1 + $0xc0] sm:$0xff]  ;;  %v2984_v37 = vpack.c.bf16 %v108_v31, %v107_v30 }
   0xa   :  { %2949 = vmatprep.subr.bf16.mxu0 %v2948_v20  ;;  %v94_v36 = vld [vmem:[%s4429_s1 + $0xc8] sm:$0xff]  ;;  %v2954_v38 = vpack.c.bf16 %v76_v34, %v75_v33  ;;  %v109_v39 = vld [vmem:[%s4429_s1 + $0x140] sm:$0xff]  ;;  %v95_v44 = vld [vmem:[%s4429_s1 + $0xd0] sm:$0xff] }
   0xb   :  { %v110_v40 = vld [vmem:[%s4429_s1 + $0x148] sm:$0xff]  ;;  %v2956_v41 = vpack.c.bf16 %v94_v36, %v93_v35  ;;  %v77_v42 = vld [vmem:[%s4429_s1 + $0x40] sm:$0xff]  ;;  %v96_v45 = vld [vmem:[%s4429_s1 + $0xd8] sm:$0xff] }
   0xc   :  { %2979 = vmatpush3.bf16.msra.mxu1 %v2976_v21  ;;  %v78_v43 = vld [vmem:[%s4429_s1 + $0x48] sm:$0xff]  ;;  %v2988_v46 = vpack.c.bf16 %v110_v40, %v109_v39  ;;  %v111_v47 = vld [vmem:[%s4429_s1 + $0x150] sm:$0xff]  ;;  %v49_v48 = vld [vmem:[%s4432_s0] sm:$0xff]  ;;  %v2960_v53 = vpack.c.bf16 %v96_v45, %v95_v44 }
   0xd   :  { %2981 = vmatprep.subr.bf16.mxu1 %v2980_v28  ;;  %2951 = vmatpush3.bf16.msra.mxu0 %v2950_v29  ;;  %v2958_v49 = vpack.c.bf16 %v78_v43, %v77_v42  ;;  %v112_v50 = vld [vmem:[%s4429_s1 + $0x158] sm:$0xff]  ;;  %53 = vst [vmem:[#allocation2 + $0x1] sm:$0xff] %v49_v48  ;;  %v50_v51 = vld [vmem:[%s4432_s0 + $0x8] sm:$0xff]  ;;  %v3618_v52 = vld [vmem:[%s4432_s0 + $0x10] sm:$0xff] }
   0xe   :  { %2953 = vmatprep.subr.bf16.mxu0 %v2952_v32  ;;  %186 = vmatprep.mubr.f32.mxu0 %v49_v48  ;;  %v79_v54 = vld [vmem:[%s4429_s1 + $0x50] sm:$0xff]  ;;  %v80_v55 = vld [vmem:[%s4429_s1 + $0x58] sm:$0xff]  ;;  %54 = vst [vmem:[#allocation2 + $0x9] sm:$0xff] %v50_v51  ;;  %55 = vst [vmem:[#allocation2 + $0x19] sm:$0xff] %v3618_v52  ;;  %v2992_v59 = vpack.c.bf16 %v112_v50, %v111_v47 }
   0xf   :  { %v3630_v56 = vld [vmem:[%s4432_s0 + $0x18] sm:$0xff]  ;;  %v97_v57 = vld [vmem:[%s4429_s1 + $0xe0] sm:$0xff]  ;;  %v98_v58 = vld [vmem:[%s4429_s1 + $0xe8] sm:$0xff]  ;;  %v2962_v60 = vpack.c.bf16 %v80_v55, %v79_v54 }
  0x10   :  { %2983 = vmatpush3.bf16.msra.mxu1 %v2980_v28  ;;  %56 = vst [vmem:[#allocation2 + $0x21] sm:$0xff] %v3630_v56  ;;  %v113_v61 = vld [vmem:[%s4429_s1 + $0x160] sm:$0xff]  ;;  %v114_v62 = vld [vmem:[%s4429_s1 + $0x168] sm:$0xff]  ;;  %v2964_v63 = vpack.c.bf16 %v98_v58, %v97_v57  ;;  %v99_v2 = vld [vmem:[%s4429_s1 + $0xf0] sm:$0xff] }
  0x11   :  { %2985 = vmatprep.subr.bf16.mxu1 %v2984_v37  ;;  %2955 = vmatpush3.bf16.msra.mxu0 %v2954_v38  ;;  %v81_v0 = vld [vmem:[%s4429_s1 + $0x60] sm:$0xff]  ;;  %v82_v1 = vld [vmem:[%s4429_s1 + $0x68] sm:$0xff]  ;;  %v100_v3 = vld [vmem:[%s4429_s1 + $0xf8] sm:$0xff]  ;;  %v2996_v4 = vpack.c.bf16 %v114_v62, %v113_v61 }
  0x12   :  { %2957 = vmatprep.subr.bf16.mxu0 %v2956_v41  ;;  %v2966_v5 = vpack.c.bf16 %v82_v1, %v81_v0  ;;  %v115_v6 = vld [vmem:[%s4429_s1 + $0x170] sm:$0xff]  ;;  %v116_v7 = vld [vmem:[%s4429_s1 + $0x178] sm:$0xff]  ;;  %v2968_v9 = vpack.c.bf16 %v100_v3, %v99_v2  ;;  %v33_v12 = vld [vmem:[%s4433_s7] sm:$0xff] }
  0x13   :  { %v83_v10 = vld [vmem:[%s4429_s1 + $0x70] sm:$0xff]  ;;  %v84_v11 = vld [vmem:[%s4429_s1 + $0x78] sm:$0xff]  ;;  %v34_v13 = vld [vmem:[%s4433_s7 + $0x8] sm:$0xff]  ;;  %v3000_v14 = vpack.c.bf16 %v116_v7, %v115_v6 }
  0x14   :  { %2987 = vmatpush3.bf16.msra.mxu1 %v2984_v37  ;;  %v2970_v15 = vpack.c.bf16 %v84_v11, %v83_v10  ;;  %v3675_v16 = vpack.c.bf16 %v34_v13, %v33_v12  ;;  %v35_v17 = vld [vmem:[%s4433_s7 + $0x10] sm:$0xff]  ;;  %v36_v18 = vld [vmem:[%s4433_s7 + $0x18] sm:$0xff]  ;;  %v57_v19 = vld [vmem:[#allocation2] sm:$0xff] }
  0x15   :  { %2989 = vmatprep.subr.bf16.mxu1 %v2988_v46  ;;  %2959 = vmatpush3.bf16.msra.mxu0 %v2958_v49  ;;  %v65_v8 = vld [vmem:[#allocation2 + $0x2] sm:$0xff]  ;;  %v3684_v20 = vpack.c.bf16 %v36_v18, %v35_v17  ;;  %v66_v21 = vld [vmem:[#allocation2 + $0xa] sm:$0xff]  ;;  %v40_v29 = vld [vmem:[%s4433_s7 + $0x38] sm:$0xff] }
  0x16   :  { %2961 = vmatprep.subr.bf16.mxu0 %v2960_v53  ;;  %2516 = vmatprep.mubr.f32.mxu1 %v65_v8  ;;  %v37_v22 = vld [vmem:[%s4433_s7 + $0x20] sm:$0xff]  ;;  %v38_v23 = vld [vmem:[%s4433_s7 + $0x28] sm:$0xff]  ;;  %v39_v28 = vld [vmem:[%s4433_s7 + $0x30] sm:$0xff] }
  0x17   :  { %v67_v24 = vld [vmem:[#allocation2 + $0x1a] sm:$0xff]  ;;  %v58_v25 = vld [vmem:[#allocation2 + $0x8] sm:$0xff]  ;;  %v3695_v26 = vpack.c.bf16 %v38_v23, %v37_v22  ;;  %v3708_v31 = vpack.c.bf16 %v40_v29, %v39_v28  ;;  %v43_v36 = vld [vmem:[%s4433_s7 + $0x50] sm:$0xff] }
  0x18   :  { %2991 = vmatpush3.bf16.msra.mxu1 %v2988_v46  ;;  %v68_v27 = vld [vmem:[#allocation2 + $0x22] sm:$0xff]  ;;  %v59_v30 = vld [vmem:[#allocation2 + $0x18] sm:$0xff]  ;;  %v47_v42 = vld [vmem:[%s4433_s7 + $0x70] sm:$0xff] }
  0x19   :  { %2993 = vmatprep.subr.bf16.mxu1 %v2992_v59  ;;  %2963 = vmatpush3.bf16.msra.mxu0 %v2962_v60  ;;  %v41_v32 = vld [vmem:[%s4433_s7 + $0x40] sm:$0xff]  ;;  %v42_v33 = vld [vmem:[%s4433_s7 + $0x48] sm:$0xff]  ;;  %v44_v37 = vld [vmem:[%s4433_s7 + $0x58] sm:$0xff] }
  0x1a   :  { %2965 = vmatprep.subr.bf16.mxu0 %v2964_v63  ;;  %v60_v34 = vld [vmem:[#allocation2 + $0x20] sm:$0xff]  ;;  %v3721_v35 = vpack.c.bf16 %v42_v33, %v41_v32  ;;  %v3737_v38 = vpack.c.bf16 %v44_v37, %v43_v36  ;;  %v46_v40 = vld [vmem:[%s4433_s7 + $0x68] sm:$0xff]  ;;  %v48_v43 = vld [vmem:[%s4433_s7 + $0x78] sm:$0xff] }
  0x1b   :  { %v45_v39 = vld [vmem:[%s4433_s7 + $0x60] sm:$0xff]  ;;  %v3761_v44 = vpack.c.bf16 %v48_v43, %v47_v42  ;;  %v1951_v43 = vld [vmem:[%s4429_s1 + $0x288] sm:$0xff] }
  0x1c   :  { %2995 = vmatpush3.bf16.msra.mxu1 %v2992_v59  ;;  %v3749_v41 = vpack.c.bf16 %v46_v40, %v45_v39  ;;  %v1916_v47 = vld [vmem:[%s4434_s2] ss:$0 sm:$0xff]  ;;  %v1935_v39 = vld [vmem:[%s4429_s1 + $0x208] sm:$0xff] }
  0x1d   :  { %2997 = vmatprep.subr.bf16.mxu1 %v2996_v4  ;;  %2967 = vmatpush3.bf16.msra.mxu0 %v2966_v5  ;;  %v1934_v37 = vld [vmem:[%s4429_s1 + $0x200] sm:$0xff] }
  0x1e   :  { %2969 = vmatprep.subr.bf16.mxu0 %v2968_v9  ;;  %v3068_v40 = vpack.c.bf16 %v1935_v39, %v1934_v37  ;;  %v1950_v42 = vld [vmem:[%s4429_s1 + $0x280] sm:$0xff]  ;;  %v1929_v37 = vld [vmem:[%s4429_s1 + $0x1d8] sm:$0xff] }
  0x20   :  { %2999 = vmatpush3.bf16.msra.mxu1 %v2996_v4 }
  0x21   :  { %3001 = vmatprep.subr.bf16.mxu1 %v3000_v14  ;;  %2971 = vmatpush3.bf16.msra.mxu0 %v2970_v15 }
  0x22   :  { %3005 = vmatprep.subr.bf16.mxu0 %v3675_v16 }
  0x24   :  { %3003 = vmatpush3.bf16.msra.mxu1 %v3000_v14  ;;  %187 = vmatmul.mubr.f32.vlgmr.msra.gmra.mrb[0].mxu0 %v57_v19 }
  0x25   :  { %3037 = vmatprep.subr.bf16.mxu1 %v3675_v16  ;;  %191 = vmatprep.mubr.f32.mxu0 %v50_v51 }
  0x26   :  { %3007 = vmatpush3.bf16.msra.mxu0 %v3675_v16 }
  0x27   :  { %2517 = vmatmul.mubr.f32.vlgmr.msra.gmra.mrb[0].mxu1 %v66_v21  ;;  %3009 = vmatprep.subr.bf16.mxu0 %v3684_v20 }
  0x28   :  { %2519 = vmatprep.mubr.f32.mxu1 %v67_v24  ;;  %3039 = vmatpush3.bf16.msra.mxu1 %v3675_v16 }
  0x29   :  { %192 = vmatmul.mubr.f32.gmra.mrb[2].mxu0 %v58_v25  ;;  %3041 = vmatprep.subr.bf16.mxu1 %v3684_v20 }
  0x2a   :  { %196 = vmatprep.mubr.f32.mxu0 %v3618_v52  ;;  %3011 = vmatpush3.bf16.msra.mxu0 %v3684_v20 }
  0x2b   :  { %2520 = vmatmul.mubr.f32.gmra.mrb[2].mxu1 %v68_v27  ;;  %3013 = vmatprep.subr.bf16.mxu0 %v3695_v26 }
  0x2c   :  { %3043 = vmatpush3.bf16.msra.mxu1 %v3684_v20 }
  0x2d   :  { %197 = vmatmul.mubr.f32.gmra.mrb[4].mxu0 %v59_v30  ;;  %3045 = vmatprep.subr.bf16.mxu1 %v3695_v26 }
  0x2e   :  { %201 = vmatprep.mubr.f32.mxu0 %v3630_v56  ;;  %3015 = vmatpush3.bf16.msra.mxu0 %v3695_v26 }
  0x2f   :  { %3017 = vmatprep.subr.bf16.mxu0 %v3708_v31 }
  0x30   :  { %3047 = vmatpush3.bf16.msra.mxu1 %v3695_v26 }
  0x31   :  { %202 = vmatmul.mubr.f32.gmra.mrb[6].mxu0 %v60_v34  ;;  %3049 = vmatprep.subr.bf16.mxu1 %v3708_v31 }
  0x32   :  { %3019 = vmatpush3.bf16.msra.mxu0 %v3708_v31 }
  0x33   :  { %3021 = vmatprep.subr.bf16.mxu0 %v3721_v35 }
  0x34   :  { %3051 = vmatpush3.bf16.msra.mxu1 %v3708_v31 }
  0x35   :  { %3053 = vmatprep.subr.bf16.mxu1 %v3721_v35 }
  0x36   :  { %3023 = vmatpush3.bf16.msra.mxu0 %v3721_v35 }
  0x37   :  { %3025 = vmatprep.subr.bf16.mxu0 %v3737_v38 }
  0x38   :  { %3055 = vmatpush3.bf16.msra.mxu1 %v3721_v35 }
  0x39   :  { %3057 = vmatprep.subr.bf16.mxu1 %v3737_v38 }
  0x3a   :  { %3027 = vmatpush3.bf16.msra.mxu0 %v3737_v38 }
  0x3b   :  { %3029 = vmatprep.subr.bf16.mxu0 %v3749_v41 }
  0x3c   :  { %3059 = vmatpush3.bf16.msra.mxu1 %v3737_v38 }
  0x3d   :  { %3061 = vmatprep.subr.bf16.mxu1 %v3749_v41 }
  0x3e   :  { %3031 = vmatpush3.bf16.msra.mxu0 %v3749_v41 }
  0x3f   :  { %3033 = vmatprep.subr.bf16.mxu0 %v3761_v44 }
  0x40   :  { %3063 = vmatpush3.bf16.msra.mxu1 %v3749_v41 }
  0x41   :  { %3065 = vmatprep.subr.bf16.mxu1 %v3761_v44 }
  0x42   :  { %3035 = vmatpush3.bf16.msra.mxu0 %v3761_v44 }
  0x43   :  { %3069 = vmatprep.subr.bf16.mxu0 %v3068_v40  ;;  %v1946_v40 = vld [vmem:[%s4429_s1 + $0x260] sm:$0xff] }
  0x44   :  { %3067 = vmatpush3.bf16.msra.mxu1 %v3761_v44 }
  0xf7   :  { %v2100_v45 = vpop.f32.mrb[0].mxu0 }
  0xf8   :  { %v2101_v46 = vpop.f32.mrb[1].mxu0 }
  0xf9   :  { %v2102_v48 = vadd.f32 %v2101_v46, %v2100_v45  ;;  %v1918_v45 = vld [vmem:[%s4429_s1 + $0x180] sm:$0xff]  ;;  %v3100_v46 = vpack.c.bf16 %v1951_v43, %v1950_v42  ;;  %v1947_v42 = vld [vmem:[%s4429_s1 + $0x268] sm:$0xff] }
  0xfa   :  { %v2518_v49 = vpop.f32.mrb[0].mxu1  ;;  %v3092_v43 = vpack.c.bf16 %v1947_v42, %v1946_v40 }
  0xfb   :  { %v273_v50 = vpop.f32.mrb[1].mxu1  ;;  %v189_v52 = vadd.f32 %v2102_v48, %v1916_v47  ;;  %3101 = vmatprep.subr.bf16.mxu1 %v3100_v46 }
  0xfc   :  { %v2103_v51 = vpop.f32.mrb[2].mxu0 }
  0xfd   :  { %v2104_v53 = vpop.f32.mrb[3].mxu0  ;;  %v274_v55 = vadd.f32 %v273_v50, %v189_v52  ;;  %v1937_v50 = vld [vmem:[%s4429_s1 + $0x218] sm:$0xff]  ;;  %v1952_v52 = vld [vmem:[%s4429_s1 + $0x290] sm:$0xff] }
  0xfe   :  { %v2105_v54 = vadd.f32 %v2104_v53, %v2103_v51  ;;  %v2521_v56 = vpop.f32.mrb[2].mxu1  ;;  %v1953_v53 = vld [vmem:[%s4429_s1 + $0x298] sm:$0xff] }
  0xff   :  { %v283_v57 = vpop.f32.mrb[3].mxu1  ;;  %v292_v59 = vmax.f32 %v274_v55, 0.0  ;;  %v3104_v55 = vpack.c.bf16 %v1953_v53, %v1952_v52  ;;  %v1949_v52 = vld [vmem:[%s4429_s1 + $0x278] sm:$0xff]  ;;  %v1964_v53 = vld [vmem:[%s4429_s1 + $0x2f0] sm:$0xff] }
 0x100   :  { %v194_v58 = vadd.f32 %v2105_v54, %v1916_v47  ;;  %v2106_v60 = vpop.f32.mrb[4].mxu0  ;;  %v1920_v54 = vld [vmem:[%s4429_s1 + $0x190] sm:$0xff] }
 0x101   :  { %v2107_v61 = vpop.f32.mrb[5].mxu0  ;;  %2554 = vmatprep.mubr.f32.mxu0 %v292_v59 }
 0x102   :  { %v279_v62 = vadd.f32 %v2518_v49, %v194_v58  ;;  %v2108_v63 = vadd.f32 %v2107_v61, %v2106_v60  ;;  %v1936_v49 = vld [vmem:[%s4429_s1 + $0x210] sm:$0xff]  ;;  %v1938_v58 = vld [vmem:[%s4429_s1 + $0x220] sm:$0xff] }
 0x103   :  { %v3072_v51 = vpack.c.bf16 %v1937_v50, %v1936_v49  ;;  %v1954_v61 = vld [vmem:[%s4429_s1 + $0x2a0] sm:$0xff]  ;;  %v1931_v49 = vld [vmem:[%s4429_s1 + $0x1e8] sm:$0xff] }
 0x104   :  { %v293_v0 = vmax.f32 %v279_v62, 0.0  ;;  %v2109_v1 = vpop.f32.mrb[6].mxu0  ;;  %v199_v2 = vadd.f32 %v2108_v63, %v1916_v47  ;;  %v1955_v62 = vld [vmem:[%s4429_s1 + $0x2a8] sm:$0xff]  ;;  %v1922_v63 = vld [vmem:[%s4429_s1 + $0x1a0] sm:$0xff] }
 0x105   :  { %v2110_v3 = vpop.f32.mrb[7].mxu0 }
 0x106   :  { %v2111_v4 = vadd.f32 %v2110_v3, %v2109_v1  ;;  %v284_v5 = vadd.f32 %v283_v57, %v199_v2  ;;  %2555 = vmatmul.mubr.f32.vlgmr.msra.gmra.mrb[8].mxu0 %v293_v0  ;;  %v1923_v1 = vld [vmem:[%s4429_s1 + $0x1a8] sm:$0xff]  ;;  %v1940_v3 = vld [vmem:[%s4429_s1 + $0x230] sm:$0xff] }
 0x107   :  { %v3078_v2 = vpack.c.bf16 %v1923_v1, %v1922_v63 }
 0x108   :  { %v204_v6 = vadd.f32 %v2111_v4, %v1916_v47  ;;  %v294_v7 = vmax.f32 %v284_v5, 0.0  ;;  %v1919_v47 = vld [vmem:[%s4429_s1 + $0x188] sm:$0xff]  ;;  %v1941_v4 = vld [vmem:[%s4429_s1 + $0x238] sm:$0xff] }
 0x109   :  { %v3070_v48 = vpack.c.bf16 %v1919_v47, %v1918_v45  ;;  %v3080_v5 = vpack.c.bf16 %v1941_v4, %v1940_v3  ;;  %v1962_v45 = vld [vmem:[%s4429_s1 + $0x2e0] sm:$0xff] }
 0x10a   :  { %2557 = vmatprep.mubr.f32.mxu0 %v294_v7  ;;  %v289_v8 = vadd.f32 %v2521_v56, %v204_v6  ;;  %v1921_v56 = vld [vmem:[%s4429_s1 + $0x198] sm:$0xff]  ;;  %v1956_v6 = vld [vmem:[%s4429_s1 + $0x2b0] sm:$0xff]  ;;  %v1930_v47 = vld [vmem:[%s4429_s1 + $0x1e0] sm:$0xff] }
 0x10b   :  { %3071 = vmatpush3.bf16.msra.mxu0 %v3070_v48  ;;  %v3074_v57 = vpack.c.bf16 %v1921_v56, %v1920_v54  ;;  %v3094_v50 = vpack.c.bf16 %v1931_v49, %v1930_v47  ;;  %v1932_v56 = vld [vmem:[%s4429_s1 + $0x1f0] sm:$0xff] }
 0x10c   :  { %v295_v9 = vmax.f32 %v289_v8, 0.0  ;;  %3073 = vmatprep.subr.bf16.mxu0 %v3072_v51  ;;  %v1924_v8 = vld [vmem:[%s4429_s1 + $0x1b0] sm:$0xff] }
 0x10d   :  { %v1948_v51 = vld [vmem:[%s4429_s1 + $0x270] sm:$0xff] }
 0x10e   :  { %2558 = vmatmul.mubr.f32.gmra.mrb[10].mxu0 %v295_v9  ;;  %v3096_v54 = vpack.c.bf16 %v1949_v52, %v1948_v51 }
 0x10f   :  { %3075 = vmatpush3.bf16.msra.mxu0 %v3074_v57  ;;  %v1933_v57 = vld [vmem:[%s4429_s1 + $0x1f8] sm:$0xff] }
 0x1d9   :  { %v2556_v10 = vpop.f32.mrb[8].mxu0 }
 0x1da   :  { %v362_v11 = vpop.f32.mrb[9].mxu0 }
 0x1db   :  { %v381_v12 = vadd.f32 %v2556_v10, %v362_v11  ;;  %v1925_v10 = vld [vmem:[%s4429_s1 + $0x1b8] sm:$0xff] }
 0x1dc   :  { %v3082_v11 = vpack.c.bf16 %v1925_v10, %v1924_v8 }
 0x1e1   :  { %v2559_v13 = vpop.f32.mrb[10].mxu0 }
 0x1e2   :  { %v372_v14 = vpop.f32.mrb[11].mxu0 }
 0x1e3   :  { %v382_v15 = vadd.f32 %v381_v12, %v372_v14  ;;  %v1942_v12 = vld [vmem:[%s4429_s1 + $0x240] sm:$0xff] }
 0x1e5   :  { %v383_v17 = vadd.f32 %v2559_v13, %v382_v15  ;;  %v1943_v13 = vld [vmem:[%s4429_s1 + $0x248] sm:$0xff]  ;;  %v1958_v15 = vld [vmem:[%s4429_s1 + $0x2c0] sm:$0xff] }
 0x1e6   :  { %v3084_v14 = vpack.c.bf16 %v1943_v13, %v1942_v12  ;;  %v496_v13 = vld [vmem:[%s4435_s3] sm:$0x1] }
 0x1e7   :  { %v384_v18 = vrot.slane %v383_v17, 4 }
 0x1e9   :  { %v385_v19 = vadd.f32 %v384_v18, %v383_v17  ;;  %v1959_v17 = vld [vmem:[%s4429_s1 + $0x2c8] sm:$0xff]  ;;  %v1926_v18 = vld [vmem:[%s4429_s1 + $0x1c0] sm:$0xff] }
 0x1eb   :  { %v386_v21 = vrot.slane %v385_v19, 2 }
 0x1ed   :  { %v387_v22 = vadd.f32 %v386_v21, %v385_v19  ;;  %v3116_v19 = vpack.c.bf16 %v1959_v17, %v1958_v15  ;;  %v1927_v21 = vld [vmem:[%s4429_s1 + $0x1c8] sm:$0xff] }
 0x1ef   :  { %v388_v23 = vrot.slane %v387_v22, 1 }
 0x1f1   :  { %v389_v24 = vadd.f32 %v388_v23, %v387_v22  ;;  %v3086_v22 = vpack.c.bf16 %v1927_v21, %v1926_v18  ;;  %v1944_v23 = vld [vmem:[%s4429_s1 + $0x250] sm:$0xff] }
 0x1f3   :  { %v390_v25 = vmul.f32 0.001953125, %v389_v24  ;;  %v1945_v24 = vld [vmem:[%s4429_s1 + $0x258] sm:$0xff] }
 0x1f5   :  { %v3770_v27 = vsub.f32 %v292_v59, %v390_v25  ;;  %v3772_v28 = vsub.f32 %v293_v0, %v390_v25  ;;  %v3774_v29 = vsub.f32 %v294_v7, %v390_v25  ;;  %v3780_v33 = vsub.f32 %v295_v9, %v390_v25  ;;  %v1939_v59 = vld [vmem:[%s4429_s1 + $0x228] sm:$0xff]  ;;  %v1957_v7 = vld [vmem:[%s4429_s1 + $0x2b8] sm:$0xff] }
 0x1f6   :  { %v3076_v60 = vpack.c.bf16 %v1939_v59, %v1938_v58  ;;  %v3108_v0 = vpack.c.bf16 %v1955_v62, %v1954_v61  ;;  %v3112_v9 = vpack.c.bf16 %v1957_v7, %v1956_v6  ;;  %v3088_v25 = vpack.c.bf16 %v1945_v24, %v1944_v23 }
 0x1f7   :  { %v395_v30 = vmul.f32 %v3770_v27, %v3770_v27  ;;  %v396_v32 = vmul.f32 %v3772_v28, %v3772_v28  ;;  %v397_v34 = vmul.f32 %v3774_v29, %v3774_v29  ;;  %v398_v36 = vmul.f32 %v3780_v33, %v3780_v33 }
 0x1f8   :  { %3077 = vmatprep.subr.bf16.mxu0 %v3076_v60  ;;  %v3098_v59 = vpack.c.bf16 %v1933_v57, %v1932_v56 }
 0x1f9   :  { %2592 = vmatprep.mubr.f32.mxu1 %v395_v30  ;;  %3079 = vmatpush3.bf16.msra.mxu0 %v3078_v2  ;;  %v1960_v30 = vld [vmem:[%s4429_s1 + $0x2d0] sm:$0xff] }
 0x1fa   :  { %2593 = vmatmul.mubr.f32.vlgmr.msra.gmra.mrb[4].mxu1 %v396_v32  ;;  %3081 = vmatprep.subr.bf16.mxu0 %v3080_v5  ;;  %v1961_v32 = vld [vmem:[%s4429_s1 + $0x2d8] sm:$0xff] }
 0x1fb   :  { %2595 = vmatprep.mubr.f32.mxu1 %v397_v34  ;;  %3103 = vmatpush3.bf16.msra.mxu1 %v3100_v46  ;;  %v1928_v34 = vld [vmem:[%s4429_s1 + $0x1d0] sm:$0xff]  ;;  %v1963_v46 = vld [vmem:[%s4429_s1 + $0x2e8] sm:$0xff] }
 0x1fc   :  { %3105 = vmatprep.subr.bf16.mxu1 %v3104_v55  ;;  %v3090_v39 = vpack.c.bf16 %v1929_v37, %v1928_v34  ;;  %v3124_v48 = vpack.c.bf16 %v1963_v46, %v1962_v45  ;;  %v1966_v46 = vld [vmem:[%s4434_s2 + $0x1] ss:$0 sm:$0xff] }
 0x1fd   :  { %3083 = vmatpush3.bf16.msra.mxu0 %v3082_v11  ;;  %v498_v11 = vlaneseq }
 0x1fe   :  { %2596 = vmatmul.mubr.f32.gmra.mrb[6].mxu1 %v398_v36  ;;  %3085 = vmatprep.subr.bf16.mxu0 %v3084_v14  ;;  %v3120_v36 = vpack.c.bf16 %v1961_v32, %v1960_v30 }
 0x1ff   :  { %3107 = vmatpush3.bf16.msra.mxu1 %v3104_v55  ;;  %v1965_v55 = vld [vmem:[%s4429_s1 + $0x2f8] sm:$0xff]  ;;  %v499_v12 = vshrl.u32 %v498_v11, 7 }
 0x200   :  { %3109 = vmatprep.subr.bf16.mxu1 %v3108_v0  ;;  %v3128_v58 = vpack.c.bf16 %v1965_v55, %v1964_v53 }
 0x201   :  { %3087 = vmatpush3.bf16.msra.mxu0 %v3086_v22  ;;  %v3935_v14 = vsub.s32 0, %v499_v12 }
 0x202   :  { %3089 = vmatprep.subr.bf16.mxu0 %v3088_v25 }
 0x203   :  { %3111 = vmatpush3.bf16.msra.mxu1 %v3108_v0 }
 0x204   :  { %3113 = vmatprep.subr.bf16.mxu1 %v3112_v9 }
 0x205   :  { %3091 = vmatpush3.bf16.msra.mxu0 %v3090_v39 }
 0x206   :  { %3093 = vmatprep.subr.bf16.mxu0 %v3092_v43 }
 0x207   :  { %3115 = vmatpush3.bf16.msra.mxu1 %v3112_v9 }
 0x208   :  { %3117 = vmatprep.subr.bf16.mxu1 %v3116_v19 }
 0x209   :  { %3095 = vmatpush3.bf16.msra.mxu0 %v3094_v50 }
 0x20a   :  { %3097 = vmatprep.subr.bf16.mxu0 %v3096_v54 }
 0x20b   :  { %3119 = vmatpush3.bf16.msra.mxu1 %v3116_v19  ;;  %v1917_v19 = vld [vmem:[%s4436_s4] ss:$0 sm:$0xff] }
 0x20c   :  { %3121 = vmatprep.subr.bf16.mxu1 %v3120_v36 }
 0x20d   :  { %3099 = vmatpush3.bf16.msra.mxu0 %v3098_v59 }
 0x20e   :  { %3133 = vmatprep.subr.bf16.mxu0 %v3675_v16 }
 0x20f   :  { %3123 = vmatpush3.bf16.msra.mxu1 %v3120_v36 }
 0x210   :  { %3125 = vmatprep.subr.bf16.mxu1 %v3124_v48 }
 0x213   :  { %3127 = vmatpush3.bf16.msra.mxu1 %v3124_v48 }
 0x214   :  { %3129 = vmatprep.subr.bf16.mxu1 %v3128_v58 }
 0x217   :  { %3131 = vmatpush3.bf16.msra.mxu1 %v3128_v58 }
 0x218   :  { %3165 = vmatprep.subr.bf16.mxu1 %v3675_v16 }
 0x2cd   :  { %v2594_v60 = vpop.f32.mrb[4].mxu1 }
 0x2ce   :  { %v465_v61 = vpop.f32.mrb[5].mxu1 }
 0x2cf   :  { %v484_v62 = vadd.f32 %v2594_v60, %v465_v61 }
 0x2d1   :  { %v2597_v63 = vpop.f32.mrb[6].mxu1 }
 0x2d2   :  { %v475_v0 = vpop.f32.mrb[7].mxu1 }
 0x2d3   :  { %v485_v1 = vadd.f32 %v484_v62, %v475_v0 }
 0x2d5   :  { %v486_v2 = vadd.f32 %v2597_v63, %v485_v1 }
 0x2d7   :  { %v487_v3 = vrot.slane %v486_v2, 4 }
 0x2d9   :  { %v488_v4 = vadd.f32 %v487_v3, %v486_v2 }
 0x2db   :  { %v489_v5 = vrot.slane %v488_v4, 2 }
 0x2dd   :  { %v490_v6 = vadd.f32 %v489_v5, %v488_v4 }
 0x2df   :  { %v491_v7 = vrot.slane %v490_v6, 1 }
 0x2e1   :  { %v492_v8 = vadd.f32 %v491_v7, %v490_v6 }
 0x2e3   :  { %v493_v9 = vmul.f32 0.001953125, %v492_v8 }
 0x2e5   :  { %v494_v10 = vadd.f32 1e-05, %v493_v9 }
 0x2e7   :  { %3453 = vrsqrt.f32 %v494_v10 }
 0x2f1   :  { %v3454_v15 = vpop.eup %3453 }
 0x2f2   :  { %v497_v17 = vmul.f32 %v3454_v15, %v496_v13 }
 0x2f4   :  { %v501_v18 = vrot.slane %v497_v17, %v3935_v14 }
 0x2f6   :  { %v502_v21 = vmul.f32 %v501_v18, %v3770_v27  ;;  %v503_v22 = vmul.f32 %v501_v18, %v3772_v28  ;;  %v504_v23 = vmul.f32 %v501_v18, %v3774_v29  ;;  %v505_v24 = vmul.f32 %v501_v18, %v3780_v33 }
 0x2f8   :  { %v3945_v25 = vadd.f32 %v1917_v19, %v502_v21  ;;  %v3947_v30 = vadd.f32 %v1917_v19, %v503_v22  ;;  %v3949_v32 = vadd.f32 %v1917_v19, %v504_v23  ;;  %v3951_v34 = vadd.f32 %v1917_v19, %v505_v24 }
 0x2fa   :  { %515 = vst [vmem:[#allocation2 + $0x1] sm:$0xff] %v3945_v25  ;;  %516 = vst [vmem:[#allocation2 + $0x9] sm:$0xff] %v3947_v30  ;;  %649 = vmatprep.mubr.f32.mxu0 %v3945_v25 }
 0x2fb   :  { %517 = vst [vmem:[#allocation2 + $0x19] sm:$0xff] %v3949_v32  ;;  %518 = vst [vmem:[#allocation2 + $0x21] sm:$0xff] %v3951_v34 }
 0x301   :  { %v527_v27 = vld [vmem:[#allocation2 + $0x2] sm:$0xff]  ;;  %v528_v29 = vld [vmem:[#allocation2 + $0xa] sm:$0xff] }
 0x302   :  { %v519_v28 = vld [vmem:[#allocation2] sm:$0xff]  ;;  %2630 = vmatprep.mubr.f32.mxu1 %v527_v27  ;;  %v520_v36 = vld [vmem:[#allocation2 + $0x8] sm:$0xff]  ;;  %v521_v39 = vld [vmem:[#allocation2 + $0x18] sm:$0xff] }
 0x303   :  { %650 = vmatmul.mubr.f32.vlgmr.msra.gmra.mrb[12].mxu0 %v519_v28  ;;  %2631 = vmatmul.mubr.f32.vlgmr.msra.gmra.mrb[8].mxu1 %v528_v29  ;;  %v529_v33 = vld [vmem:[#allocation2 + $0x1a] sm:$0xff]  ;;  %v530_v37 = vld [vmem:[#allocation2 + $0x22] sm:$0xff] }
 0x304   :  { %654 = vmatprep.mubr.f32.mxu0 %v3947_v30  ;;  %2633 = vmatprep.mubr.f32.mxu1 %v529_v33  ;;  %v522_v40 = vld [vmem:[#allocation2 + $0x20] sm:$0xff] }
 0x305   :  { %3135 = vmatpush3.bf16.msra.mxu0 %v3675_v16  ;;  %3167 = vmatpush3.bf16.msra.mxu1 %v3675_v16 }
 0x306   :  { %3137 = vmatprep.subr.bf16.mxu0 %v3684_v20  ;;  %3169 = vmatprep.subr.bf16.mxu1 %v3684_v20 }
 0x307   :  { %655 = vmatmul.mubr.f32.gmra.mrb[14].mxu0 %v520_v36  ;;  %2634 = vmatmul.mubr.f32.gmra.mrb[10].mxu1 %v530_v37 }
 0x308   :  { %659 = vmatprep.mubr.f32.mxu0 %v3949_v32 }
 0x309   :  { %3139 = vmatpush3.bf16.msra.mxu0 %v3684_v20  ;;  %3171 = vmatpush3.bf16.msra.mxu1 %v3684_v20 }
 0x30a   :  { %3141 = vmatprep.subr.bf16.mxu0 %v3695_v26  ;;  %3173 = vmatprep.subr.bf16.mxu1 %v3695_v26 }
 0x30b   :  { %660 = vmatmul.mubr.f32.gmra.mrb[16].mxu0 %v521_v39 }
 0x30c   :  { %664 = vmatprep.mubr.f32.mxu0 %v3951_v34 }
 0x30d   :  { %3143 = vmatpush3.bf16.msra.mxu0 %v3695_v26  ;;  %3175 = vmatpush3.bf16.msra.mxu1 %v3695_v26 }
 0x30e   :  { %3145 = vmatprep.subr.bf16.mxu0 %v3708_v31  ;;  %3177 = vmatprep.subr.bf16.mxu1 %v3708_v31 }
 0x30f   :  { %665 = vmatmul.mubr.f32.gmra.mrb[18].mxu0 %v522_v40 }
 0x311   :  { %3147 = vmatpush3.bf16.msra.mxu0 %v3708_v31  ;;  %3179 = vmatpush3.bf16.msra.mxu1 %v3708_v31 }
 0x312   :  { %3149 = vmatprep.subr.bf16.mxu0 %v3721_v35  ;;  %3181 = vmatprep.subr.bf16.mxu1 %v3721_v35 }
 0x315   :  { %3151 = vmatpush3.bf16.msra.mxu0 %v3721_v35  ;;  %3183 = vmatpush3.bf16.msra.mxu1 %v3721_v35 }
 0x316   :  { %3153 = vmatprep.subr.bf16.mxu0 %v3737_v38  ;;  %3185 = vmatprep.subr.bf16.mxu1 %v3737_v38 }
 0x319   :  { %3155 = vmatpush3.bf16.msra.mxu0 %v3737_v38  ;;  %3187 = vmatpush3.bf16.msra.mxu1 %v3737_v38 }
 0x31a   :  { %3157 = vmatprep.subr.bf16.mxu0 %v3749_v41  ;;  %3189 = vmatprep.subr.bf16.mxu1 %v3749_v41 }
 0x31d   :  { %3159 = vmatpush3.bf16.msra.mxu0 %v3749_v41  ;;  %3191 = vmatpush3.bf16.msra.mxu1 %v3749_v41 }
 0x31e   :  { %3161 = vmatprep.subr.bf16.mxu0 %v3761_v44  ;;  %3193 = vmatprep.subr.bf16.mxu1 %v3761_v44 }
 0x321   :  { %3163 = vmatpush3.bf16.msra.mxu0 %v3761_v44  ;;  %3195 = vmatpush3.bf16.msra.mxu1 %v3761_v44 }
 0x3d6   :  { %v2204_v42 = vpop.f32.mrb[12].mxu0  ;;  %v2632_v43 = vpop.f32.mrb[8].mxu1 }
 0x3d7   :  { %v2205_v45 = vpop.f32.mrb[13].mxu0  ;;  %v736_v48 = vpop.f32.mrb[9].mxu1 }
 0x3d8   :  { %v2206_v47 = vadd.f32 %v2205_v45, %v2204_v42  ;;  %v1984_v42 = vld [vmem:[%s4429_s1 + $0x380] sm:$0xff] }
 0x3da   :  { %v652_v49 = vadd.f32 %v2206_v47, %v1966_v46  ;;  %v2207_v50 = vpop.f32.mrb[14].mxu0  ;;  %v2635_v51 = vpop.f32.mrb[10].mxu1  ;;  %v2001_v47 = vld [vmem:[%s4429_s1 + $0x408] sm:$0xff] }
 0x3db   :  { %v2208_v52 = vpop.f32.mrb[15].mxu0  ;;  %v746_v55 = vpop.f32.mrb[11].mxu1 }
 0x3dc   :  { %v737_v53 = vadd.f32 %v736_v48, %v652_v49  ;;  %v2209_v54 = vadd.f32 %v2208_v52, %v2207_v50  ;;  %v1968_v48 = vld [vmem:[%s4429_s1 + $0x300] sm:$0xff]  ;;  %v1969_v50 = vld [vmem:[%s4429_s1 + $0x308] sm:$0xff]  ;;  %v1986_v52 = vld [vmem:[%s4429_s1 + $0x390] sm:$0xff] }
 0x3de   :  { %v755_v56 = vmax.f32 %v737_v53, 0.0  ;;  %v657_v57 = vadd.f32 %v2209_v54, %v1966_v46  ;;  %v2210_v58 = vpop.f32.mrb[16].mxu0  ;;  %v1987_v53 = vld [vmem:[%s4429_s1 + $0x398] sm:$0xff] }
 0x3df   :  { %v2211_v59 = vpop.f32.mrb[17].mxu0  ;;  %v3200_v54 = vpack.c.bf16 %v1987_v53, %v1986_v52  ;;  %v2012_v53 = vld [vmem:[%s4429_s1 + $0x460] sm:$0xff] }
 0x3e0   :  { %v742_v60 = vadd.f32 %v2632_v43, %v657_v57  ;;  %v2212_v61 = vadd.f32 %v2211_v59, %v2210_v58  ;;  %2668 = vmatprep.mubr.f32.mxu0 %v755_v56  ;;  %v1985_v43 = vld [vmem:[%s4429_s1 + $0x388] sm:$0xff]  ;;  %v1970_v57 = vld [vmem:[%s4429_s1 + $0x310] sm:$0xff]  ;;  %v1971_v59 = vld [vmem:[%s4429_s1 + $0x318] sm:$0xff] }
 0x3e1   :  { %v3196_v45 = vpack.c.bf16 %v1985_v43, %v1984_v42  ;;  %v2010_v43 = vld [vmem:[%s4429_s1 + $0x450] sm:$0xff] }
 0x3e2   :  { %v756_v62 = vmax.f32 %v742_v60, 0.0  ;;  %v662_v63 = vadd.f32 %v2212_v61, %v1966_v46  ;;  %v2213_v0 = vpop.f32.mrb[18].mxu0  ;;  %v3202_v60 = vpack.c.bf16 %v1971_v59, %v1970_v57  ;;  %v1988_v61 = vld [vmem:[%s4429_s1 + $0x3a0] sm:$0xff]  ;;  %v1981_v57 = vld [vmem:[%s4429_s1 + $0x368] sm:$0xff]  ;;  %v1999_v59 = vld [vmem:[%s4429_s1 + $0x3f8] sm:$0xff] }
 0x3e3   :  { %v2214_v1 = vpop.f32.mrb[19].mxu0  ;;  %3197 = vmatprep.subr.bf16.mxu0 %v3196_v45  ;;  %v2011_v45 = vld [vmem:[%s4429_s1 + $0x458] sm:$0xff] }
 0x3e4   :  { %v2215_v2 = vadd.f32 %v2214_v1, %v2213_v0  ;;  %2669 = vmatmul.mubr.f32.vlgmr.msra.gmra.mrb[20].mxu0 %v756_v62  ;;  %v747_v3 = vadd.f32 %v746_v55, %v662_v63  ;;  %v2002_v55 = vld [vmem:[%s4429_s1 + $0x410] sm:$0xff]  ;;  %v2004_v0 = vld [vmem:[%s4429_s1 + $0x420] sm:$0xff]  ;;  %v2005_v1 = vld [vmem:[%s4429_s1 + $0x428] sm:$0xff] }
 0x3e6   :  { %v667_v4 = vadd.f32 %v2215_v2, %v1966_v46  ;;  %v757_v5 = vmax.f32 %v747_v3, 0.0  ;;  %v2000_v46 = vld [vmem:[%s4429_s1 + $0x400] sm:$0xff]  ;;  %v3236_v3 = vpack.c.bf16 %v2005_v1, %v2004_v0  ;;  %v1982_v0 = vld [vmem:[%s4429_s1 + $0x370] sm:$0xff] }
 0x3e7   :  { %v3228_v49 = vpack.c.bf16 %v2001_v47, %v2000_v46  ;;  %v1972_v2 = vld [vmem:[%s4429_s1 + $0x320] sm:$0xff]  ;;  %v3248_v46 = vpack.c.bf16 %v2011_v45, %v2010_v43  ;;  %v1978_v47 = vld [vmem:[%s4429_s1 + $0x350] sm:$0xff] }
 0x3e8   :  { %2671 = vmatprep.mubr.f32.mxu0 %v757_v5  ;;  %v752_v6 = vadd.f32 %v2635_v51, %v667_v4  ;;  %v3198_v51 = vpack.c.bf16 %v1969_v50, %v1968_v48  ;;  %v1973_v4 = vld [vmem:[%s4429_s1 + $0x328] sm:$0xff]  ;;  %v1979_v48 = vld [vmem:[%s4429_s1 + $0x358] sm:$0xff]  ;;  %v1996_v50 = vld [vmem:[%s4429_s1 + $0x3e0] sm:$0xff] }
 0x3e9   :  { %3229 = vmatprep.subr.bf16.mxu1 %v3228_v49 }
 0x3ea   :  { %v758_v7 = vmax.f32 %v752_v6, 0.0  ;;  %3199 = vmatpush3.bf16.msra.mxu0 %v3198_v51  ;;  %v1990_v6 = vld [vmem:[%s4429_s1 + $0x3b0] sm:$0xff]  ;;  %v1997_v51 = vld [vmem:[%s4429_s1 + $0x3e8] sm:$0xff] }
 0x3eb   :  { %3201 = vmatprep.subr.bf16.mxu0 %v3200_v54  ;;  %v3220_v52 = vpack.c.bf16 %v1997_v51, %v1996_v50  ;;  %v2013_v54 = vld [vmem:[%s4429_s1 + $0x468] sm:$0xff] }
 0x3ec   :  { %2672 = vmatmul.mubr.f32.gmra.mrb[22].mxu0 %v758_v7 }
 0x3ee   :  { %3203 = vmatpush3.bf16.msra.mxu0 %v3202_v60 }
 0x4b7   :  { %v2670_v8 = vpop.f32.mrb[20].mxu0 }
 0x4b8   :  { %v825_v9 = vpop.f32.mrb[21].mxu0 }
 0x4b9   :  { %v844_v10 = vadd.f32 %v2670_v8, %v825_v9  ;;  %v2006_v9 = vld [vmem:[%s4429_s1 + $0x430] sm:$0xff] }
 0x4bf   :  { %v2673_v11 = vpop.f32.mrb[22].mxu0 }
 0x4c0   :  { %v835_v12 = vpop.f32.mrb[23].mxu0 }
 0x4c1   :  { %v845_v13 = vadd.f32 %v844_v10, %v835_v12  ;;  %v2007_v10 = vld [vmem:[%s4429_s1 + $0x438] sm:$0xff] }
 0x4c2   :  { %v3240_v12 = vpack.c.bf16 %v2007_v10, %v2006_v9 }
 0x4c3   :  { %v846_v15 = vadd.f32 %v2673_v11, %v845_v13  ;;  %v1974_v11 = vld [vmem:[%s4429_s1 + $0x330] sm:$0xff]  ;;  %v1975_v13 = vld [vmem:[%s4429_s1 + $0x338] sm:$0xff] }
 0x4c5   :  { %v847_v17 = vrot.slane %v846_v15, 4 }
 0x4c7   :  { %v848_v18 = vadd.f32 %v847_v17, %v846_v15  ;;  %v3210_v15 = vpack.c.bf16 %v1975_v13, %v1974_v11  ;;  %v1992_v17 = vld [vmem:[%s4429_s1 + $0x3c0] sm:$0xff] }
 0x4c9   :  { %v849_v19 = vrot.slane %v848_v18, 2 }
 0x4cb   :  { %v850_v21 = vadd.f32 %v849_v19, %v848_v18  ;;  %v1993_v18 = vld [vmem:[%s4429_s1 + $0x3c8] sm:$0xff] }
 0x4cc   :  { %v3212_v19 = vpack.c.bf16 %v1993_v18, %v1992_v17 }
 0x4cd   :  { %v851_v22 = vrot.slane %v850_v21, 1 }
 0x4cf   :  { %v852_v23 = vadd.f32 %v851_v22, %v850_v21  ;;  %v2008_v21 = vld [vmem:[%s4429_s1 + $0x440] sm:$0xff]  ;;  %v2009_v22 = vld [vmem:[%s4429_s1 + $0x448] sm:$0xff] }
 0x4d1   :  { %v853_v24 = vmul.f32 0.001953125, %v852_v23  ;;  %v1976_v23 = vld [vmem:[%s4429_s1 + $0x340] sm:$0xff] }
 0x4d3   :  { %v3994_v27 = vsub.f32 %v755_v56, %v853_v24  ;;  %v3996_v28 = vsub.f32 %v756_v62, %v853_v24  ;;  %v3998_v29 = vsub.f32 %v757_v5, %v853_v24  ;;  %v4004_v37 = vsub.f32 %v758_v7, %v853_v24  ;;  %v2003_v56 = vld [vmem:[%s4429_s1 + $0x418] sm:$0xff]  ;;  %v1989_v62 = vld [vmem:[%s4429_s1 + $0x3a8] sm:$0xff] }
 0x4d4   :  { %v3232_v58 = vpack.c.bf16 %v2003_v56, %v2002_v55  ;;  %v3204_v63 = vpack.c.bf16 %v1989_v62, %v1988_v61  ;;  %v3206_v5 = vpack.c.bf16 %v1973_v4, %v1972_v2  ;;  %v1991_v7 = vld [vmem:[%s4429_s1 + $0x3b8] sm:$0xff]  ;;  %v3244_v24 = vpack.c.bf16 %v2009_v22, %v2008_v21  ;;  %v1980_v55 = vld [vmem:[%s4429_s1 + $0x360] sm:$0xff]  ;;  %v2014_v62 = vld [vmem:[%s4429_s1 + $0x470] sm:$0xff] }
 0x4d5   :  { %v858_v33 = vmul.f32 %v3994_v27, %v3994_v27  ;;  %v859_v36 = vmul.f32 %v3996_v28, %v3996_v28  ;;  %v860_v39 = vmul.f32 %v3998_v29, %v3998_v29  ;;  %v861_v40 = vmul.f32 %v4004_v37, %v4004_v37  ;;  %v1983_v2 = vld [vmem:[%s4429_s1 + $0x378] sm:$0xff]  ;;  %v959_v22 = vld [vmem:[%s4435_s3 + $0x1] sm:$0x1] }
 0x4d6   :  { %3205 = vmatprep.subr.bf16.mxu0 %v3204_v63  ;;  %v3208_v8 = vpack.c.bf16 %v1991_v7, %v1990_v6  ;;  %v3252_v56 = vpack.c.bf16 %v2013_v54, %v2012_v53  ;;  %v3222_v60 = vpack.c.bf16 %v1981_v57, %v1980_v55  ;;  %v2015_v63 = vld [vmem:[%s4429_s1 + $0x478] sm:$0xff] }
 0x4d7   :  { %2706 = vmatprep.mubr.f32.mxu1 %v858_v33  ;;  %3207 = vmatpush3.bf16.msra.mxu0 %v3206_v5  ;;  %v1977_v33 = vld [vmem:[%s4429_s1 + $0x348] sm:$0xff]  ;;  %v3256_v1 = vpack.c.bf16 %v2015_v63, %v2014_v62 }
 0x4d8   :  { %2707 = vmatmul.mubr.f32.vlgmr.msra.gmra.mrb[12].mxu1 %v859_v36  ;;  %3209 = vmatprep.subr.bf16.mxu0 %v3208_v8  ;;  %v3214_v36 = vpack.c.bf16 %v1977_v33, %v1976_v23 }
 0x4d9   :  { %2709 = vmatprep.mubr.f32.mxu1 %v860_v39  ;;  %3231 = vmatpush3.bf16.msra.mxu1 %v3228_v49  ;;  %v1994_v39 = vld [vmem:[%s4429_s1 + $0x3d0] sm:$0xff]  ;;  %v3218_v49 = vpack.c.bf16 %v1979_v48, %v1978_v47 }
 0x4da   :  { %3233 = vmatprep.subr.bf16.mxu1 %v3232_v58 }
 0x4db   :  { %3211 = vmatpush3.bf16.msra.mxu0 %v3210_v15 }
 0x4dc   :  { %2710 = vmatmul.mubr.f32.gmra.mrb[14].mxu1 %v861_v40  ;;  %3213 = vmatprep.subr.bf16.mxu0 %v3212_v19  ;;  %v1995_v40 = vld [vmem:[%s4429_s1 + $0x3d8] sm:$0xff] }
 0x4dd   :  { %3235 = vmatpush3.bf16.msra.mxu1 %v3232_v58  ;;  %v3216_v42 = vpack.c.bf16 %v1995_v40, %v1994_v39  ;;  %v1998_v58 = vld [vmem:[%s4429_s1 + $0x3f0] sm:$0xff] }
 0x4de   :  { %3237 = vmatprep.subr.bf16.mxu1 %v3236_v3  ;;  %v3224_v61 = vpack.c.bf16 %v1999_v59, %v1998_v58 }
 0x4df   :  { %3215 = vmatpush3.bf16.msra.mxu0 %v3214_v36  ;;  %v1967_v36 = vld [vmem:[%s4436_s4 + $0x1] ss:$0 sm:$0xff] }
 0x4e0   :  { %3217 = vmatprep.subr.bf16.mxu0 %v3216_v42 }
 0x4e1   :  { %3239 = vmatpush3.bf16.msra.mxu1 %v3236_v3  ;;  %v3226_v3 = vpack.c.bf16 %v1983_v2, %v1982_v0 }
 0x4e2   :  { %3241 = vmatprep.subr.bf16.mxu1 %v3240_v12 }
 0x4e3   :  { %3219 = vmatpush3.bf16.msra.mxu0 %v3218_v49 }
 0x4e4   :  { %3221 = vmatprep.subr.bf16.mxu0 %v3220_v52 }
 0x4e5   :  { %3243 = vmatpush3.bf16.msra.mxu1 %v3240_v12 }
 0x4e6   :  { %3245 = vmatprep.subr.bf16.mxu1 %v3244_v24 }
 0x4e7   :  { %3223 = vmatpush3.bf16.msra.mxu0 %v3222_v60 }
 0x4e8   :  { %3225 = vmatprep.subr.bf16.mxu0 %v3224_v61 }
 0x4e9   :  { %3247 = vmatpush3.bf16.msra.mxu1 %v3244_v24 }
 0x4ea   :  { %3249 = vmatprep.subr.bf16.mxu1 %v3248_v46 }
 0x4eb   :  { %3227 = vmatpush3.bf16.msra.mxu0 %v3226_v3 }
 0x4ec   :  { %3261 = vmatprep.subr.bf16.mxu0 %v3675_v16 }
 0x4ed   :  { %3251 = vmatpush3.bf16.msra.mxu1 %v3248_v46 }
 0x4ee   :  { %3253 = vmatprep.subr.bf16.mxu1 %v3252_v56 }
 0x4f1   :  { %3255 = vmatpush3.bf16.msra.mxu1 %v3252_v56  ;;  %v2016_v56 = vld [vmem:[%s4434_s2 + $0x2] ss:$0 sm:$0xff] }
 0x4f2   :  { %3257 = vmatprep.subr.bf16.mxu1 %v3256_v1 }
 0x4f5   :  { %3259 = vmatpush3.bf16.msra.mxu1 %v3256_v1 }
 0x4f6   :  { %3293 = vmatprep.subr.bf16.mxu1 %v3675_v16 }
 0x5ab   :  { %v2708_v4 = vpop.f32.mrb[12].mxu1 }
 0x5ac   :  { %v928_v5 = vpop.f32.mrb[13].mxu1 }
 0x5ad   :  { %v947_v6 = vadd.f32 %v2708_v4, %v928_v5 }
 0x5af   :  { %v2711_v7 = vpop.f32.mrb[14].mxu1 }
 0x5b0   :  { %v938_v8 = vpop.f32.mrb[15].mxu1 }
 0x5b1   :  { %v948_v9 = vadd.f32 %v947_v6, %v938_v8 }
 0x5b3   :  { %v949_v10 = vadd.f32 %v2711_v7, %v948_v9 }
 0x5b5   :  { %v950_v11 = vrot.slane %v949_v10, 4 }
 0x5b7   :  { %v951_v12 = vadd.f32 %v950_v11, %v949_v10 }
 0x5b9   :  { %v952_v13 = vrot.slane %v951_v12, 2 }
 0x5bb   :  { %v953_v15 = vadd.f32 %v952_v13, %v951_v12 }
 0x5bd   :  { %v954_v17 = vrot.slane %v953_v15, 1 }
 0x5bf   :  { %v955_v18 = vadd.f32 %v954_v17, %v953_v15 }
 0x5c1   :  { %v956_v19 = vmul.f32 0.001953125, %v955_v18 }
 0x5c3   :  { %v957_v21 = vadd.f32 1e-05, %v956_v19 }
 0x5c5   :  { %3455 = vrsqrt.f32 %v957_v21 }
 0x5cf   :  { %v3456_v23 = vpop.eup %3455 }
 0x5d0   :  { %v960_v24 = vmul.f32 %v3456_v23, %v959_v22 }
 0x5d2   :  { %v964_v33 = vrot.slane %v960_v24, %v3935_v14 }
 0x5d4   :  { %v965_v39 = vmul.f32 %v964_v33, %v3994_v27  ;;  %v966_v40 = vmul.f32 %v964_v33, %v3996_v28  ;;  %v967_v42 = vmul.f32 %v964_v33, %v3998_v29  ;;  %v968_v43 = vmul.f32 %v964_v33, %v4004_v37 }
 0x5d6   :  { %v974_v45 = vadd.f32 %v1967_v36, %v965_v39  ;;  %v975_v46 = vadd.f32 %v1967_v36, %v966_v40  ;;  %v976_v47 = vadd.f32 %v1967_v36, %v967_v42  ;;  %v977_v48 = vadd.f32 %v1967_v36, %v968_v43 }
 0x5d8   :  { %978 = vst [vmem:[#allocation2 + $0x1] sm:$0xff] %v974_v45  ;;  %979 = vst [vmem:[#allocation2 + $0x9] sm:$0xff] %v975_v46  ;;  %1112 = vmatprep.mubr.f32.mxu0 %v974_v45 }
 0x5d9   :  { %980 = vst [vmem:[#allocation2 + $0x19] sm:$0xff] %v976_v47  ;;  %981 = vst [vmem:[#allocation2 + $0x21] sm:$0xff] %v977_v48 }
 0x5df   :  { %v990_v49 = vld [vmem:[#allocation2 + $0x2] sm:$0xff]  ;;  %v991_v51 = vld [vmem:[#allocation2 + $0xa] sm:$0xff] }
 0x5e0   :  { %v982_v50 = vld [vmem:[#allocation2] sm:$0xff]  ;;  %2744 = vmatprep.mubr.f32.mxu1 %v990_v49  ;;  %v983_v28 = vld [vmem:[#allocation2 + $0x8] sm:$0xff]  ;;  %v984_v37 = vld [vmem:[#allocation2 + $0x18] sm:$0xff] }
 0x5e1   :  { %1113 = vmatmul.mubr.f32.vlgmr.msra.gmra.mrb[24].mxu0 %v982_v50  ;;  %2745 = vmatmul.mubr.f32.vlgmr.msra.gmra.mrb[16].mxu1 %v991_v51  ;;  %v992_v27 = vld [vmem:[#allocation2 + $0x1a] sm:$0xff]  ;;  %v993_v29 = vld [vmem:[#allocation2 + $0x22] sm:$0xff] }
 0x5e2   :  { %1117 = vmatprep.mubr.f32.mxu0 %v975_v46  ;;  %2747 = vmatprep.mubr.f32.mxu1 %v992_v27  ;;  %v985_v52 = vld [vmem:[#allocation2 + $0x20] sm:$0xff] }
 0x5e3   :  { %3263 = vmatpush3.bf16.msra.mxu0 %v3675_v16  ;;  %3295 = vmatpush3.bf16.msra.mxu1 %v3675_v16 }
 0x5e4   :  { %3265 = vmatprep.subr.bf16.mxu0 %v3684_v20  ;;  %3297 = vmatprep.subr.bf16.mxu1 %v3684_v20 }
 0x5e5   :  { %1118 = vmatmul.mubr.f32.gmra.mrb[26].mxu0 %v983_v28  ;;  %2748 = vmatmul.mubr.f32.gmra.mrb[18].mxu1 %v993_v29 }
 0x5e6   :  { %1122 = vmatprep.mubr.f32.mxu0 %v976_v47 }
 0x5e7   :  { %3267 = vmatpush3.bf16.msra.mxu0 %v3684_v20  ;;  %3299 = vmatpush3.bf16.msra.mxu1 %v3684_v20 }
 0x5e8   :  { %3269 = vmatprep.subr.bf16.mxu0 %v3695_v26  ;;  %3301 = vmatprep.subr.bf16.mxu1 %v3695_v26 }
 0x5e9   :  { %1123 = vmatmul.mubr.f32.gmra.mrb[28].mxu0 %v984_v37 }
 0x5ea   :  { %1127 = vmatprep.mubr.f32.mxu0 %v977_v48 }
 0x5eb   :  { %3271 = vmatpush3.bf16.msra.mxu0 %v3695_v26  ;;  %3303 = vmatpush3.bf16.msra.mxu1 %v3695_v26 }
 0x5ec   :  { %3273 = vmatprep.subr.bf16.mxu0 %v3708_v31  ;;  %3305 = vmatprep.subr.bf16.mxu1 %v3708_v31 }
 0x5ed   :  { %1128 = vmatmul.mubr.f32.gmra.mrb[30].mxu0 %v985_v52 }
 0x5ef   :  { %3275 = vmatpush3.bf16.msra.mxu0 %v3708_v31  ;;  %3307 = vmatpush3.bf16.msra.mxu1 %v3708_v31 }
 0x5f0   :  { %3277 = vmatprep.subr.bf16.mxu0 %v3721_v35  ;;  %3309 = vmatprep.subr.bf16.mxu1 %v3721_v35 }
 0x5f3   :  { %3279 = vmatpush3.bf16.msra.mxu0 %v3721_v35  ;;  %3311 = vmatpush3.bf16.msra.mxu1 %v3721_v35 }
 0x5f4   :  { %3281 = vmatprep.subr.bf16.mxu0 %v3737_v38  ;;  %3313 = vmatprep.subr.bf16.mxu1 %v3737_v38 }
 0x5f7   :  { %3283 = vmatpush3.bf16.msra.mxu0 %v3737_v38  ;;  %3315 = vmatpush3.bf16.msra.mxu1 %v3737_v38 }
 0x5f8   :  { %3285 = vmatprep.subr.bf16.mxu0 %v3749_v41  ;;  %3317 = vmatprep.subr.bf16.mxu1 %v3749_v41 }
 0x5fb   :  { %3287 = vmatpush3.bf16.msra.mxu0 %v3749_v41  ;;  %3319 = vmatpush3.bf16.msra.mxu1 %v3749_v41 }
 0x5fc   :  { %3289 = vmatprep.subr.bf16.mxu0 %v3761_v44  ;;  %3321 = vmatprep.subr.bf16.mxu1 %v3761_v44 }
 0x5ff   :  { %3291 = vmatpush3.bf16.msra.mxu0 %v3761_v44  ;;  %3323 = vmatpush3.bf16.msra.mxu1 %v3761_v44 }
 0x6b4   :  { %v2308_v53 = vpop.f32.mrb[24].mxu0  ;;  %v2746_v54 = vpop.f32.mrb[16].mxu1 }
 0x6b5   :  { %v2309_v55 = vpop.f32.mrb[25].mxu0  ;;  %v1199_v58 = vpop.f32.mrb[17].mxu1 }
 0x6b6   :  { %v2310_v57 = vadd.f32 %v2309_v55, %v2308_v53  ;;  %v2034_v53 = vld [vmem:[%s4429_s1 + $0x500] sm:$0xff] }
 0x6b8   :  { %v1115_v59 = vadd.f32 %v2310_v57, %v2016_v56  ;;  %v2311_v60 = vpop.f32.mrb[26].mxu0  ;;  %v2749_v61 = vpop.f32.mrb[18].mxu1  ;;  %v2051_v57 = vld [vmem:[%s4429_s1 + $0x588] sm:$0xff] }
 0x6b9   :  { %v2312_v62 = vpop.f32.mrb[27].mxu0  ;;  %v1209_v1 = vpop.f32.mrb[19].mxu1 }
 0x6ba   :  { %v1200_v63 = vadd.f32 %v1199_v58, %v1115_v59  ;;  %v2313_v0 = vadd.f32 %v2312_v62, %v2311_v60  ;;  %v2018_v58 = vld [vmem:[%s4429_s1 + $0x480] sm:$0xff]  ;;  %v2019_v60 = vld [vmem:[%s4429_s1 + $0x488] sm:$0xff]  ;;  %v2036_v62 = vld [vmem:[%s4429_s1 + $0x510] sm:$0xff] }
 0x6bc   :  { %v1218_v2 = vmax.f32 %v1200_v63, 0.0  ;;  %v1120_v3 = vadd.f32 %v2313_v0, %v2016_v56  ;;  %v2314_v4 = vpop.f32.mrb[28].mxu0  ;;  %v2037_v63 = vld [vmem:[%s4429_s1 + $0x518] sm:$0xff] }
 0x6bd   :  { %v2315_v5 = vpop.f32.mrb[29].mxu0  ;;  %v3328_v0 = vpack.c.bf16 %v2037_v63, %v2036_v62  ;;  %v2062_v63 = vld [vmem:[%s4429_s1 + $0x5e0] sm:$0xff] }
 0x6be   :  { %v1205_v6 = vadd.f32 %v2746_v54, %v1120_v3  ;;  %v2316_v7 = vadd.f32 %v2315_v5, %v2314_v4  ;;  %2782 = vmatprep.mubr.f32.mxu0 %v1218_v2  ;;  %v2035_v54 = vld [vmem:[%s4429_s1 + $0x508] sm:$0xff]  ;;  %v2020_v3 = vld [vmem:[%s4429_s1 + $0x490] sm:$0xff]  ;;  %v2021_v5 = vld [vmem:[%s4429_s1 + $0x498] sm:$0xff] }
 0x6bf   :  { %v3324_v55 = vpack.c.bf16 %v2035_v54, %v2034_v53  ;;  %v2060_v54 = vld [vmem:[%s4429_s1 + $0x5d0] sm:$0xff] }
 0x6c0   :  { %v1219_v8 = vmax.f32 %v1205_v6, 0.0  ;;  %v1125_v9 = vadd.f32 %v2316_v7, %v2016_v56  ;;  %v2317_v10 = vpop.f32.mrb[30].mxu0  ;;  %v3330_v6 = vpack.c.bf16 %v2021_v5, %v2020_v3  ;;  %v2038_v7 = vld [vmem:[%s4429_s1 + $0x520] sm:$0xff]  ;;  %v2031_v3 = vld [vmem:[%s4429_s1 + $0x4e8] sm:$0xff]  ;;  %v2049_v5 = vld [vmem:[%s4429_s1 + $0x578] sm:$0xff] }
 0x6c1   :  { %v2318_v11 = vpop.f32.mrb[31].mxu0  ;;  %3325 = vmatprep.subr.bf16.mxu0 %v3324_v55  ;;  %v2061_v55 = vld [vmem:[%s4429_s1 + $0x5d8] sm:$0xff] }
 0x6c2   :  { %v2319_v12 = vadd.f32 %v2318_v11, %v2317_v10  ;;  %2783 = vmatmul.mubr.f32.vlgmr.msra.gmra.mrb[32].mxu0 %v1219_v8  ;;  %v1210_v13 = vadd.f32 %v1209_v1, %v1125_v9  ;;  %v2052_v1 = vld [vmem:[%s4429_s1 + $0x590] sm:$0xff]  ;;  %v2054_v10 = vld [vmem:[%s4429_s1 + $0x5a0] sm:$0xff]  ;;  %v2055_v11 = vld [vmem:[%s4429_s1 + $0x5a8] sm:$0xff] }
 0x6c4   :  { %v1130_v15 = vadd.f32 %v2319_v12, %v2016_v56  ;;  %v1220_v17 = vmax.f32 %v1210_v13, 0.0  ;;  %v2050_v56 = vld [vmem:[%s4429_s1 + $0x580] sm:$0xff]  ;;  %v3364_v13 = vpack.c.bf16 %v2055_v11, %v2054_v10  ;;  %v2032_v10 = vld [vmem:[%s4429_s1 + $0x4f0] sm:$0xff] }
 0x6c5   :  { %v3356_v59 = vpack.c.bf16 %v2051_v57, %v2050_v56  ;;  %v2022_v12 = vld [vmem:[%s4429_s1 + $0x4a0] sm:$0xff]  ;;  %v2028_v56 = vld [vmem:[%s4429_s1 + $0x4d0] sm:$0xff]  ;;  %v3376_v57 = vpack.c.bf16 %v2061_v55, %v2060_v54 }
 0x6c6   :  { %2785 = vmatprep.mubr.f32.mxu0 %v1220_v17  ;;  %v1215_v18 = vadd.f32 %v2749_v61, %v1130_v15  ;;  %v3326_v61 = vpack.c.bf16 %v2019_v60, %v2018_v58  ;;  %v2023_v15 = vld [vmem:[%s4429_s1 + $0x4a8] sm:$0xff]  ;;  %v2029_v58 = vld [vmem:[%s4429_s1 + $0x4d8] sm:$0xff]  ;;  %v2046_v60 = vld [vmem:[%s4429_s1 + $0x560] sm:$0xff] }
 0x6c7   :  { %3357 = vmatprep.subr.bf16.mxu1 %v3356_v59 }
 0x6c8   :  { %v1221_v19 = vmax.f32 %v1215_v18, 0.0  ;;  %3327 = vmatpush3.bf16.msra.mxu0 %v3326_v61  ;;  %v2040_v18 = vld [vmem:[%s4429_s1 + $0x530] sm:$0xff]  ;;  %v2047_v61 = vld [vmem:[%s4429_s1 + $0x568] sm:$0xff] }
 0x6c9   :  { %3329 = vmatprep.subr.bf16.mxu0 %v3328_v0  ;;  %v3348_v62 = vpack.c.bf16 %v2047_v61, %v2046_v60  ;;  %v2063_v0 = vld [vmem:[%s4429_s1 + $0x5e8] sm:$0xff] }
 0x6ca   :  { %2786 = vmatmul.mubr.f32.gmra.mrb[34].mxu0 %v1221_v19 }
 0x6cc   :  { %3331 = vmatpush3.bf16.msra.mxu0 %v3330_v6 }
 0x795   :  { %v2784_v21 = vpop.f32.mrb[32].mxu0 }
 0x796   :  { %v1288_v22 = vpop.f32.mrb[33].mxu0 }
 0x797   :  { %v1307_v23 = vadd.f32 %v2784_v21, %v1288_v22  ;;  %v2056_v22 = vld [vmem:[%s4429_s1 + $0x5b0] sm:$0xff] }
 0x79d   :  { %v2787_v24 = vpop.f32.mrb[34].mxu0 }
 0x79e   :  { %v1298_v33 = vpop.f32.mrb[35].mxu0 }
 0x79f   :  { %v1308_v36 = vadd.f32 %v1307_v23, %v1298_v33  ;;  %v2057_v23 = vld [vmem:[%s4429_s1 + $0x5b8] sm:$0xff] }
 0x7a0   :  { %v3368_v33 = vpack.c.bf16 %v2057_v23, %v2056_v22 }
 0x7a1   :  { %v1309_v39 = vadd.f32 %v2787_v24, %v1308_v36  ;;  %v2024_v24 = vld [vmem:[%s4429_s1 + $0x4b0] sm:$0xff]  ;;  %v2025_v36 = vld [vmem:[%s4429_s1 + $0x4b8] sm:$0xff] }
 0x7a3   :  { %v1310_v40 = vrot.slane %v1309_v39, 4 }
 0x7a5   :  { %v1311_v42 = vadd.f32 %v1310_v40, %v1309_v39  ;;  %v3338_v39 = vpack.c.bf16 %v2025_v36, %v2024_v24  ;;  %v2042_v40 = vld [vmem:[%s4429_s1 + $0x540] sm:$0xff] }
 0x7a7   :  { %v1312_v43 = vrot.slane %v1311_v42, 2 }
 0x7a9   :  { %v1313_v45 = vadd.f32 %v1312_v43, %v1311_v42  ;;  %v2043_v42 = vld [vmem:[%s4429_s1 + $0x548] sm:$0xff] }
 0x7aa   :  { %v3340_v43 = vpack.c.bf16 %v2043_v42, %v2042_v40 }
 0x7ab   :  { %v1314_v46 = vrot.slane %v1313_v45, 1 }
 0x7ad   :  { %v1315_v47 = vadd.f32 %v1314_v46, %v1313_v45  ;;  %v2058_v45 = vld [vmem:[%s4429_s1 + $0x5c0] sm:$0xff]  ;;  %v2059_v46 = vld [vmem:[%s4429_s1 + $0x5c8] sm:$0xff] }
 0x7af   :  { %v1316_v48 = vmul.f32 0.001953125, %v1315_v47  ;;  %v2026_v47 = vld [vmem:[%s4429_s1 + $0x4c0] sm:$0xff] }
 0x7b1   :  { %v4200_v49 = vsub.f32 %v1218_v2, %v1316_v48  ;;  %v4202_v50 = vsub.f32 %v1219_v8, %v1316_v48  ;;  %v4204_v51 = vsub.f32 %v1220_v17, %v1316_v48  ;;  %v4210_v29 = vsub.f32 %v1221_v19, %v1316_v48  ;;  %v2053_v2 = vld [vmem:[%s4429_s1 + $0x598] sm:$0xff]  ;;  %v2039_v8 = vld [vmem:[%s4429_s1 + $0x528] sm:$0xff] }
 0x7b2   :  { %v3360_v4 = vpack.c.bf16 %v2053_v2, %v2052_v1  ;;  %v3332_v9 = vpack.c.bf16 %v2039_v8, %v2038_v7  ;;  %v3334_v17 = vpack.c.bf16 %v2023_v15, %v2022_v12  ;;  %v2041_v19 = vld [vmem:[%s4429_s1 + $0x538] sm:$0xff]  ;;  %v3372_v48 = vpack.c.bf16 %v2059_v46, %v2058_v45  ;;  %v2030_v1 = vld [vmem:[%s4429_s1 + $0x4e0] sm:$0xff]  ;;  %v2064_v8 = vld [vmem:[%s4429_s1 + $0x5f0] sm:$0xff] }
 0x7b3   :  { %v1321_v27 = vmul.f32 %v4200_v49, %v4200_v49  ;;  %v1322_v28 = vmul.f32 %v4202_v50, %v4202_v50  ;;  %v1323_v37 = vmul.f32 %v4204_v51, %v4204_v51  ;;  %v1324_v52 = vmul.f32 %v4210_v29, %v4210_v29  ;;  %v2033_v12 = vld [vmem:[%s4429_s1 + $0x4f8] sm:$0xff]  ;;  %v1422_v46 = vld [vmem:[%s4435_s3 + $0x2] sm:$0x1] }
 0x7b4   :  { %3333 = vmatprep.subr.bf16.mxu0 %v3332_v9  ;;  %v3336_v21 = vpack.c.bf16 %v2041_v19, %v2040_v18  ;;  %v3380_v2 = vpack.c.bf16 %v2063_v0, %v2062_v63  ;;  %v3350_v6 = vpack.c.bf16 %v2031_v3, %v2030_v1  ;;  %v2065_v9 = vld [vmem:[%s4429_s1 + $0x5f8] sm:$0xff] }
 0x7b5   :  { %2820 = vmatprep.mubr.f32.mxu1 %v1321_v27  ;;  %3335 = vmatpush3.bf16.msra.mxu0 %v3334_v17  ;;  %v2027_v27 = vld [vmem:[%s4429_s1 + $0x4c8] sm:$0xff]  ;;  %v3384_v11 = vpack.c.bf16 %v2065_v9, %v2064_v8 }
 0x7b6   :  { %2821 = vmatmul.mubr.f32.vlgmr.msra.gmra.mrb[20].mxu1 %v1322_v28  ;;  %3337 = vmatprep.subr.bf16.mxu0 %v3336_v21  ;;  %v3342_v28 = vpack.c.bf16 %v2027_v27, %v2026_v47 }
 0x7b7   :  { %2823 = vmatprep.mubr.f32.mxu1 %v1323_v37  ;;  %3359 = vmatpush3.bf16.msra.mxu1 %v3356_v59  ;;  %v2044_v37 = vld [vmem:[%s4429_s1 + $0x550] sm:$0xff]  ;;  %v3346_v59 = vpack.c.bf16 %v2029_v58, %v2028_v56 }
 0x7b8   :  { %3361 = vmatprep.subr.bf16.mxu1 %v3360_v4 }
 0x7b9   :  { %3339 = vmatpush3.bf16.msra.mxu0 %v3338_v39 }
 0x7ba   :  { %2824 = vmatmul.mubr.f32.gmra.mrb[22].mxu1 %v1324_v52  ;;  %3341 = vmatprep.subr.bf16.mxu0 %v3340_v43  ;;  %v2045_v52 = vld [vmem:[%s4429_s1 + $0x558] sm:$0xff] }
 0x7bb   :  { %3363 = vmatpush3.bf16.msra.mxu1 %v3360_v4  ;;  %v3344_v53 = vpack.c.bf16 %v2045_v52, %v2044_v37  ;;  %v2048_v4 = vld [vmem:[%s4429_s1 + $0x570] sm:$0xff] }
 0x7bc   :  { %3365 = vmatprep.subr.bf16.mxu1 %v3364_v13  ;;  %v3352_v7 = vpack.c.bf16 %v2049_v5, %v2048_v4 }
 0x7bd   :  { %3343 = vmatpush3.bf16.msra.mxu0 %v3342_v28  ;;  %v2017_v28 = vld [vmem:[%s4436_s4 + $0x2] ss:$0 sm:$0xff] }
 0x7be   :  { %3345 = vmatprep.subr.bf16.mxu0 %v3344_v53 }
 0x7bf   :  { %3367 = vmatpush3.bf16.msra.mxu1 %v3364_v13  ;;  %v3354_v13 = vpack.c.bf16 %v2033_v12, %v2032_v10 }
 0x7c0   :  { %3369 = vmatprep.subr.bf16.mxu1 %v3368_v33 }
 0x7c1   :  { %3347 = vmatpush3.bf16.msra.mxu0 %v3346_v59 }
 0x7c2   :  { %3349 = vmatprep.subr.bf16.mxu0 %v3348_v62 }
 0x7c3   :  { %3371 = vmatpush3.bf16.msra.mxu1 %v3368_v33 }
 0x7c4   :  { %3373 = vmatprep.subr.bf16.mxu1 %v3372_v48 }
 0x7c5   :  { %3351 = vmatpush3.bf16.msra.mxu0 %v3350_v6 }
 0x7c6   :  { %3353 = vmatprep.subr.bf16.mxu0 %v3352_v7 }
 0x7c7   :  { %3375 = vmatpush3.bf16.msra.mxu1 %v3372_v48 }
 0x7c8   :  { %3377 = vmatprep.subr.bf16.mxu1 %v3376_v57 }
 0x7c9   :  { %3355 = vmatpush3.bf16.msra.mxu0 %v3354_v13 }
 0x7ca   :  { %3389 = vmatprep.subr.bf16.mxu0 %v3675_v16 }
 0x7cb   :  { %3379 = vmatpush3.bf16.msra.mxu1 %v3376_v57 }
 0x7cc   :  { %3381 = vmatprep.subr.bf16.mxu1 %v3380_v2 }
 0x7cf   :  { %3383 = vmatpush3.bf16.msra.mxu1 %v3380_v2 }
 0x7d0   :  { %3385 = vmatprep.subr.bf16.mxu1 %v3384_v11 }
 0x7d3   :  { %3387 = vmatpush3.bf16.msra.mxu1 %v3384_v11 }
 0x7d4   :  { %3421 = vmatprep.subr.bf16.mxu1 %v3675_v16 }
 0x889   :  { %v2822_v15 = vpop.f32.mrb[20].mxu1 }
 0x88a   :  { %v1391_v17 = vpop.f32.mrb[21].mxu1 }
 0x88b   :  { %v1410_v18 = vadd.f32 %v2822_v15, %v1391_v17 }
 0x88d   :  { %v2825_v19 = vpop.f32.mrb[22].mxu1 }
 0x88e   :  { %v1401_v21 = vpop.f32.mrb[23].mxu1 }
 0x88f   :  { %v1411_v22 = vadd.f32 %v1410_v18, %v1401_v21 }
 0x891   :  { %v1412_v23 = vadd.f32 %v2825_v19, %v1411_v22 }
 0x893   :  { %v1413_v24 = vrot.slane %v1412_v23, 4 }
 0x895   :  { %v1414_v33 = vadd.f32 %v1413_v24, %v1412_v23 }
 0x897   :  { %v1415_v36 = vrot.slane %v1414_v33, 2 }
 0x899   :  { %v1416_v39 = vadd.f32 %v1415_v36, %v1414_v33 }
 0x89b   :  { %v1417_v40 = vrot.slane %v1416_v39, 1 }
 0x89d   :  { %v1418_v42 = vadd.f32 %v1417_v40, %v1416_v39 }
 0x89f   :  { %v1419_v43 = vmul.f32 0.001953125, %v1418_v42 }
 0x8a1   :  { %v1420_v45 = vadd.f32 1e-05, %v1419_v43 }
 0x8a3   :  { %3457 = vrsqrt.f32 %v1420_v45 }
 0x8ad   :  { %v3458_v47 = vpop.eup %3457 }
 0x8ae   :  { %v1423_v48 = vmul.f32 %v3458_v47, %v1422_v46 }
 0x8b0   :  { %v1427_v27 = vrot.slane %v1423_v48, %v3935_v14 }
 0x8b2   :  { %v1428_v37 = vmul.f32 %v1427_v27, %v4200_v49  ;;  %v1429_v52 = vmul.f32 %v1427_v27, %v4202_v50  ;;  %v1430_v53 = vmul.f32 %v1427_v27, %v4204_v51  ;;  %v1431_v54 = vmul.f32 %v1427_v27, %v4210_v29 }
 0x8b4   :  { %v1437_v55 = vadd.f32 %v2017_v28, %v1428_v37  ;;  %v1438_v56 = vadd.f32 %v2017_v28, %v1429_v52  ;;  %v1439_v57 = vadd.f32 %v2017_v28, %v1430_v53  ;;  %v1440_v58 = vadd.f32 %v2017_v28, %v1431_v54 }
 0x8b6   :  { %v1441_v59 = vadd.f32 %v1437_v55, %v3945_v25  ;;  %v1442_v60 = vadd.f32 %v1438_v56, %v3947_v30  ;;  %v1443_v61 = vadd.f32 %v1439_v57, %v3949_v32  ;;  %v1444_v62 = vadd.f32 %v1440_v58, %v3951_v34 }
 0x8b8   :  { %1445 = vst [vmem:[#allocation2 + $0x1] sm:$0xff] %v1441_v59  ;;  %1446 = vst [vmem:[#allocation2 + $0x9] sm:$0xff] %v1442_v60  ;;  %1579 = vmatprep.mubr.f32.mxu0 %v1441_v59 }
 0x8b9   :  { %1447 = vst [vmem:[#allocation2 + $0x19] sm:$0xff] %v1443_v61  ;;  %1448 = vst [vmem:[#allocation2 + $0x21] sm:$0xff] %v1444_v62 }
 0x8bf   :  { %v1457_v49 = vld [vmem:[#allocation2 + $0x2] sm:$0xff]  ;;  %v1458_v51 = vld [vmem:[#allocation2 + $0xa] sm:$0xff] }
 0x8c0   :  { %v1449_v50 = vld [vmem:[#allocation2] sm:$0xff]  ;;  %2858 = vmatprep.mubr.f32.mxu1 %v1457_v49  ;;  %v1450_v25 = vld [vmem:[#allocation2 + $0x8] sm:$0xff]  ;;  %v1451_v32 = vld [vmem:[#allocation2 + $0x18] sm:$0xff] }
 0x8c1   :  { %1580 = vmatmul.mubr.f32.vlgmr.msra.gmra.mrb[36].mxu0 %v1449_v50  ;;  %2859 = vmatmul.mubr.f32.vlgmr.msra.gmra.mrb[24].mxu1 %v1458_v51  ;;  %v1459_v29 = vld [vmem:[#allocation2 + $0x1a] sm:$0xff]  ;;  %v1460_v30 = vld [vmem:[#allocation2 + $0x22] sm:$0xff] }
 0x8c2   :  { %1584 = vmatprep.mubr.f32.mxu0 %v1442_v60  ;;  %2861 = vmatprep.mubr.f32.mxu1 %v1459_v29 }
 0x8c3   :  { %3391 = vmatpush3.bf16.msra.mxu0 %v3675_v16  ;;  %3423 = vmatpush3.bf16.msra.mxu1 %v3675_v16  ;;  %v1452_v16 = vld [vmem:[#allocation2 + $0x20] sm:$0xff] }
 0x8c4   :  { %3393 = vmatprep.subr.bf16.mxu0 %v3684_v20  ;;  %3425 = vmatprep.subr.bf16.mxu1 %v3684_v20 }
 0x8c5   :  { %1585 = vmatmul.mubr.f32.gmra.mrb[38].mxu0 %v1450_v25  ;;  %2862 = vmatmul.mubr.f32.gmra.mrb[26].mxu1 %v1460_v30 }
 0x8c6   :  { %1589 = vmatprep.mubr.f32.mxu0 %v1443_v61 }
 0x8c7   :  { %3395 = vmatpush3.bf16.msra.mxu0 %v3684_v20  ;;  %3427 = vmatpush3.bf16.msra.mxu1 %v3684_v20 }
 0x8c8   :  { %3397 = vmatprep.subr.bf16.mxu0 %v3695_v26  ;;  %3429 = vmatprep.subr.bf16.mxu1 %v3695_v26 }
 0x8c9   :  { %1590 = vmatmul.mubr.f32.gmra.mrb[40].mxu0 %v1451_v32 }
 0x8ca   :  { %1594 = vmatprep.mubr.f32.mxu0 %v1444_v62 }
 0x8cb   :  { %3399 = vmatpush3.bf16.msra.mxu0 %v3695_v26  ;;  %3431 = vmatpush3.bf16.msra.mxu1 %v3695_v26 }
 0x8cc   :  { %3401 = vmatprep.subr.bf16.mxu0 %v3708_v31  ;;  %3433 = vmatprep.subr.bf16.mxu1 %v3708_v31 }
 0x8cd   :  { %1595 = vmatmul.mubr.f32.gmra.mrb[42].mxu0 %v1452_v16 }
 0x8cf   :  { %3403 = vmatpush3.bf16.msra.mxu0 %v3708_v31  ;;  %3435 = vmatpush3.bf16.msra.mxu1 %v3708_v31 }
 0x8d0   :  { %3405 = vmatprep.subr.bf16.mxu0 %v3721_v35  ;;  %3437 = vmatprep.subr.bf16.mxu1 %v3721_v35 }
 0x8d3   :  { %3407 = vmatpush3.bf16.msra.mxu0 %v3721_v35  ;;  %3439 = vmatpush3.bf16.msra.mxu1 %v3721_v35  ;;  %v2066_v35 = vld [vmem:[%s4434_s2 + $0x3] ss:$0 sm:$0xff] }
 0x8d4   :  { %3409 = vmatprep.subr.bf16.mxu0 %v3737_v38  ;;  %3441 = vmatprep.subr.bf16.mxu1 %v3737_v38 }
 0x8d7   :  { %3411 = vmatpush3.bf16.msra.mxu0 %v3737_v38  ;;  %3443 = vmatpush3.bf16.msra.mxu1 %v3737_v38 }
 0x8d8   :  { %3413 = vmatprep.subr.bf16.mxu0 %v3749_v41  ;;  %3445 = vmatprep.subr.bf16.mxu1 %v3749_v41 }
 0x8db   :  { %3415 = vmatpush3.bf16.msra.mxu0 %v3749_v41  ;;  %3447 = vmatpush3.bf16.msra.mxu1 %v3749_v41 }
 0x8dc   :  { %3417 = vmatprep.subr.bf16.mxu0 %v3761_v44  ;;  %3449 = vmatprep.subr.bf16.mxu1 %v3761_v44 }
 0x8df   :  { %3419 = vmatpush3.bf16.msra.mxu0 %v3761_v44  ;;  %3451 = vmatpush3.bf16.msra.mxu1 %v3761_v44 }
 0x994   :  { %v2412_v20 = vpop.f32.mrb[36].mxu0  ;;  %v2860_v26 = vpop.f32.mrb[24].mxu1 }
 0x995   :  { %v2413_v31 = vpop.f32.mrb[37].mxu0  ;;  %v1666_v34 = vpop.f32.mrb[25].mxu1 }
 0x996   :  { %v2414_v38 = vadd.f32 %v2413_v31, %v2412_v20 }
 0x998   :  { %v1582_v63 = vadd.f32 %v2414_v38, %v2066_v35  ;;  %v2415_v0 = vpop.f32.mrb[38].mxu0  ;;  %v2863_v1 = vpop.f32.mrb[26].mxu1 }
 0x999   :  { %v2416_v2 = vpop.f32.mrb[39].mxu0  ;;  %v1676_v4 = vpop.f32.mrb[27].mxu1 }
 0x99a   :  { %v1667_v41 = vadd.f32 %v1666_v34, %v1582_v63  ;;  %v2417_v3 = vadd.f32 %v2416_v2, %v2415_v0  ;;  %v2067_v0 = vld [vmem:[%s4436_s4 + $0x3] ss:$0 sm:$0xff] }
 0x99c   :  { %v1685_v5 = vmax.f32 %v1667_v41, 0.0  ;;  %v1587_v6 = vadd.f32 %v2417_v3, %v2066_v35  ;;  %v2418_v7 = vpop.f32.mrb[40].mxu0 }
 0x99d   :  { %v2419_v44 = vpop.f32.mrb[41].mxu0 }
 0x99e   :  { %v1672_v8 = vadd.f32 %v2860_v26, %v1587_v6  ;;  %v2420_v9 = vadd.f32 %v2419_v44, %v2418_v7  ;;  %2896 = vmatprep.mubr.f32.mxu0 %v1685_v5 }
 0x9a0   :  { %v1686_v10 = vmax.f32 %v1672_v8, 0.0  ;;  %v1592_v11 = vadd.f32 %v2420_v9, %v2066_v35  ;;  %v2421_v12 = vpop.f32.mrb[42].mxu0 }
 0x9a1   :  { %v2422_v13 = vpop.f32.mrb[43].mxu0 }
 0x9a2   :  { %v2423_v15 = vadd.f32 %v2422_v13, %v2421_v12  ;;  %2897 = vmatmul.mubr.f32.vlgmr.msra.gmra.mrb[44].mxu0 %v1686_v10  ;;  %v1677_v17 = vadd.f32 %v1676_v4, %v1592_v11 }
 0x9a4   :  { %v1597_v18 = vadd.f32 %v2423_v15, %v2066_v35  ;;  %v1687_v19 = vmax.f32 %v1677_v17, 0.0  ;;  %v1889_v35 = vld [vmem:[%s4435_s3 + $0x3] sm:$0x1] }
 0x9a6   :  { %2899 = vmatprep.mubr.f32.mxu0 %v1687_v19  ;;  %v1682_v21 = vadd.f32 %v2863_v1, %v1597_v18 }
 0x9a8   :  { %v1688_v22 = vmax.f32 %v1682_v21, 0.0 }
 0x9aa   :  { %2900 = vmatmul.mubr.f32.gmra.mrb[46].mxu0 %v1688_v22 }
 0xa75   :  { %v2898_v23 = vpop.f32.mrb[44].mxu0 }
 0xa76   :  { %v1755_v24 = vpop.f32.mrb[45].mxu0 }
 0xa77   :  { %v1774_v33 = vadd.f32 %v2898_v23, %v1755_v24 }
 0xa7d   :  { %v2901_v36 = vpop.f32.mrb[46].mxu0 }
 0xa7e   :  { %v1765_v39 = vpop.f32.mrb[47].mxu0 }
 0xa7f   :  { %v1775_v40 = vadd.f32 %v1774_v33, %v1765_v39 }
 0xa81   :  { %v1776_v42 = vadd.f32 %v2901_v36, %v1775_v40 }
 0xa83   :  { %v1777_v43 = vrot.slane %v1776_v42, 4 }
 0xa85   :  { %v1778_v45 = vadd.f32 %v1777_v43, %v1776_v42 }
 0xa87   :  { %v1779_v46 = vrot.slane %v1778_v45, 2 }
 0xa89   :  { %v1780_v47 = vadd.f32 %v1779_v46, %v1778_v45 }
 0xa8b   :  { %v1781_v48 = vrot.slane %v1780_v47, 1 }
 0xa8d   :  { %v1782_v27 = vadd.f32 %v1781_v48, %v1780_v47 }
 0xa8f   :  { %v1783_v28 = vmul.f32 0.001953125, %v1782_v27 }
 0xa91   :  { %v1784_v37 = vsub.f32 %v1685_v5, %v1783_v28  ;;  %v1785_v52 = vsub.f32 %v1686_v10, %v1783_v28  ;;  %v1786_v53 = vsub.f32 %v1687_v19, %v1783_v28  ;;  %v1787_v56 = vsub.f32 %v1688_v22, %v1783_v28 }
 0xa93   :  { %v1788_v54 = vmul.f32 %v1784_v37, %v1784_v37  ;;  %v1789_v55 = vmul.f32 %v1785_v52, %v1785_v52  ;;  %v1790_v57 = vmul.f32 %v1786_v53, %v1786_v53  ;;  %v1791_v58 = vmul.f32 %v1787_v56, %v1787_v56 }
 0xa95   :  { %2934 = vmatprep.mubr.f32.mxu1 %v1788_v54 }
 0xa96   :  { %2935 = vmatmul.mubr.f32.vlgmr.msra.gmra.mrb[28].mxu1 %v1789_v55 }
 0xa97   :  { %2937 = vmatprep.mubr.f32.mxu1 %v1790_v57 }
 0xa9a   :  { %2938 = vmatmul.mubr.f32.gmra.mrb[30].mxu1 %v1791_v58 }
 0xb69   :  { %v2936_v59 = vpop.f32.mrb[28].mxu1 }
 0xb6a   :  { %v1858_v60 = vpop.f32.mrb[29].mxu1 }
 0xb6b   :  { %v1877_v61 = vadd.f32 %v2936_v59, %v1858_v60 }
 0xb6d   :  { %v2939_v62 = vpop.f32.mrb[30].mxu1 }
 0xb6e   :  { %v1868_v49 = vpop.f32.mrb[31].mxu1 }
 0xb6f   :  { %v1878_v50 = vadd.f32 %v1877_v61, %v1868_v49 }
 0xb71   :  { %v1879_v51 = vadd.f32 %v2939_v62, %v1878_v50 }
 0xb73   :  { %v1880_v29 = vrot.slane %v1879_v51, 4 }
 0xb75   :  { %v1881_v25 = vadd.f32 %v1880_v29, %v1879_v51 }
 0xb77   :  { %v1882_v30 = vrot.slane %v1881_v25, 2 }
 0xb79   :  { %v1883_v32 = vadd.f32 %v1882_v30, %v1881_v25 }
 0xb7b   :  { %v1884_v16 = vrot.slane %v1883_v32, 1 }
 0xb7d   :  { %v1885_v20 = vadd.f32 %v1884_v16, %v1883_v32 }
 0xb7f   :  { %v1886_v26 = vmul.f32 0.001953125, %v1885_v20 }
 0xb81   :  { %v1887_v31 = vadd.f32 1e-05, %v1886_v26 }
 0xb83   :  { %3459 = vrsqrt.f32 %v1887_v31 }
 0xb8d   :  { %v3460_v38 = vpop.eup %3459 }
 0xb8e   :  { %v1890_v34 = vmul.f32 %v3460_v38, %v1889_v35 }
 0xb90   :  { %v1894_v63 = vrot.slane %v1890_v34, %v3935_v14 }
 0xb92   :  { %v1895_v1 = vmul.f32 %v1894_v63, %v1784_v37  ;;  %v1896_v2 = vmul.f32 %v1894_v63, %v1785_v52  ;;  %v1897_v41 = vmul.f32 %v1894_v63, %v1786_v53  ;;  %v1898_v3 = vmul.f32 %v1894_v63, %v1787_v56 }
 0xb94   :  { %v1904_v4 = vadd.f32 %v2067_v0, %v1895_v1  ;;  %v1905_v5 = vadd.f32 %v2067_v0, %v1896_v2  ;;  %v1906_v6 = vadd.f32 %v2067_v0, %v1897_v41  ;;  %v1907_v7 = vadd.f32 %v2067_v0, %v1898_v3 }
 0xb96   :  { %1908 = vst [vmem:[%s4437_s8] sm:$0xff] %v1904_v4  ;;  %1909 = vst [vmem:[%s4437_s8 + $0x8] sm:$0xff] %v1905_v5 }
 0xb97   :  { %1910 = vst [vmem:[%s4437_s8 + $0x10] sm:$0xff] %v1906_v6  ;;  %1911 = vst [vmem:[%s4437_s8 + $0x18] sm:$0xff] %v1907_v7 }

</bundles_post_ra>
